<compile_context>
chip_gen: v6e
topology: v6e:2x2x1
jax: 0.10.0
libtpu: 0.0.40
codegen_flags: <defaults>
</compile_context>

<pallas_src>
import functools

import jax
import jax.numpy as jnp
from jax.experimental import pallas as pl
from jax.experimental.pallas import tpu as pltpu


def _round_up(x, m):
    return (x + m - 1) // m * m


def _pad_axis(a, axis, target):
    pad = target - a.shape[axis]
    if pad == 0:
        return a
    widths = [(0, 0)] * a.ndim
    widths[axis] = (0, pad)
    return jnp.pad(a, widths)


def _rnn_classifier_kernel(tokens_ref, table_ref, whh_ref, wout_ref, bout_ref,
                           out_ref, xp_ref, *, batch, num_classes, approx_recip):
    """tokens_ref: (B, T) int32 in SMEM.
       table_ref : (V, 1, Hp) f32 in VMEM -- precomputed emb @ W_ih + (b_ih + b_hh).
       whh_ref   : (Hp, Hp)  compute dtype.     wout_ref: (Hp, Cp) compute dtype.
       bout_ref  : (1, Cp)   f32.               out_ref : (Bp, Cp) f32 softmax probs.
       xp_ref    : (T, Bp, Hp) f32 scratch holding the gathered input projections."""
    seq_len, batch_p, hidden_p = xp_ref.shape

    # ---- Fused gather (prologue, off the serial path): per-(t, b) dynamic major-axis load
    # of the precomputed projection row. Padded batch rows stay zero (they never mix with
    # real rows in the recurrence and are sliced off in the wrapper).
    xp_ref[...] = jnp.zeros(xp_ref.shape, xp_ref.dtype)
    for t in range(seq_len):
        for b in range(batch):
            tok = tokens_ref[b, t]                       # scalar read from SMEM
            xp_ref[t, pl.ds(b, 1), :] = table_ref[tok]   # (1, Hp) dynamic row gather

    # ---- Serial recurrence: only h @ W_hh + tanh remain on the critical path.
    def step(t, h):
        pre = xp_ref[t] + jnp.dot(h.astype(whh_ref.dtype), whh_ref[...],
                                  preferred_element_type=jnp.float32)
        return jnp.tanh(pre)

    h0 = jnp.zeros((batch_p, hidden_p), jnp.float32)
    h = jax.lax.fori_loop(0, seq_len, step, h0, unroll=True)

    # ---- Classifier + softmax over the valid classes (padded lanes masked out).
    logits = jnp.dot(h.astype(wout_ref.dtype), wout_ref[...],
                     preferred_element_type=jnp.float32) + bout_ref[...]
    col = jax.lax.broadcasted_iota(jnp.int32, logits.shape, 1)
    logits = jnp.where(col < num_classes, logits, jnp.float32(-1e30))
    m = jnp.max(logits, axis=1, keepdims=True)
    e = jnp.exp(logits - m)
    denom = jnp.sum(e, axis=1, keepdims=True)
    out_ref[...] = e * pl.reciprocal(denom, approx=approx_recip)


def prepare_params(emb, w_ih, w_hh, b_ih, b_hh, w_out, b_out, *,
                   compute_dtype=jnp.bfloat16):
    """One-time parameter prep: fused projection table + hardware-shaped padding/casting."""
    H = w_hh.shape[0]
    C = w_out.shape[1]
    Hp = _round_up(H, 128)
    Cp = _round_up(C, 128)

    # Fused per-token input projection: emb @ W_ih + (b_ih + b_hh). Kept in f32 (it is only
    # an addend in the recurrence, never an MXU operand). Shaped (V, 1, Hp) so the kernel can
    # gather rows with a dynamic index on the leading (untiled) axis.
    table = jnp.dot(emb.astype(jnp.float32), w_ih.astype(jnp.float32),
                    precision=jax.lax.Precision.HIGHEST)
    table = table + (b_ih + b_hh).astype(jnp.float32)[None, :]
    table = _pad_axis(table, 1, Hp)[:, None, :]                       # (V, 1, Hp)
    # TODO(synk): for production vocab sizes keep this table in HBM (memory_space=pl.ANY) and
    # DMA-gather rows; the VMEM-resident layout pads every vocab row to a full (8,128) tile.

    whh = _pad_axis(_pad_axis(w_hh, 0, Hp), 1, Hp).astype(compute_dtype)
    wout = _pad_axis(_pad_axis(w_out, 0, Hp), 1, Cp).astype(compute_dtype)
    bout = _pad_axis(b_out.astype(jnp.float32), 0, Cp).reshape(1, Cp)

    return dict(table=table, whh=whh, wout=wout, bout=bout,
                hidden=H, num_classes=C)


def rnn_classifier_forward(tokens, params, *, approx_softmax=False):
    """Inference branch (y=None) of RNNClassifier: softmax probabilities (B, C)."""
    B, T = tokens.shape
    Bp = _round_up(B, 8)
    Hp = params["whh"].shape[0]
    Cp = params["wout"].shape[1]
    C = params["num_classes"]

    kernel = functools.partial(_rnn_classifier_kernel, batch=B, num_classes=C,
                               approx_recip=approx_softmax)

    itemsize = jnp.dtype(params["whh"].dtype).itemsize
    cost = pl.CostEstimate(
        flops=2 * T * Bp * Hp * Hp + 2 * Bp * Hp * Cp,
        transcendentals=T * Bp * Hp + Bp * Cp,
        bytes_accessed=(tokens.size * 4 + params["table"].size * 4
                        + (Hp * Hp + Hp * Cp) * itemsize + Cp * 4 + Bp * Cp * 4),
    )

    out = pl.pallas_call(
        kernel,
        out_shape=jax.ShapeDtypeStruct((Bp, Cp), jnp.float32),
        in_specs=[
            pl.BlockSpec(memory_space=pltpu.MemorySpace.SMEM),   # tokens (scalar table)
            pl.BlockSpec(memory_space=pltpu.MemorySpace.VMEM),   # xproj table
            pl.BlockSpec(memory_space=pltpu.MemorySpace.VMEM),   # W_hh
            pl.BlockSpec(memory_space=pltpu.MemorySpace.VMEM),   # W_out
            pl.BlockSpec(memory_space=pltpu.MemorySpace.VMEM),   # b_out
        ],
        out_specs=pl.BlockSpec(memory_space=pltpu.MemorySpace.VMEM),
        scratch_shapes=[pltpu.VMEM((T, Bp, Hp), jnp.float32)],
        cost_estimate=cost,
        # TODO(synk): for large batches on v7x, add a leading "parallel" batch grid axis
        # (dimension_semantics) so both TensorCores run independent batch slices.
    )(tokens.astype(jnp.int32), params["table"], params["whh"],
      params["wout"], params["bout"])

    return out[:B, :C]


def reference_forward(tokens, emb, w_ih, w_hh, b_ih, b_hh, w_out, b_out):
    """Pure-JAX f32 reference of the same semantics (PyTorch nn.RNN, batch_first)."""
    xe = emb[tokens]                       # (B, T, E)
    B, T, _ = xe.shape
    H = w_hh.shape[0]
    h = jnp.zeros((B, H), jnp.float32)
    for t in range(T):
        h = jnp.tanh(xe[:, t, :] @ w_ih + h @ w_hh + b_ih + b_hh)
    logits = h @ w_out + b_out
    return jax.nn.softmax(logits, axis=1)


if __name__ == "__main__":
    # Small shapes consistent with the module's __init__.
    VOCAB, EMB_DIM, HIDDEN, NUM_CLASSES = 32, 16, 32, 4
    BATCH, SEQ = 4, 8

    key = jax.random.PRNGKey(0)
    k_emb, k_ih, k_hh, k_bih, k_bhh, k_w, k_b, k_tok = jax.random.split(key, 8)

    # Deterministic parameter init (PyTorch-like uniform ranges; padding_idx=0 row is zero).
    emb = jax.random.normal(k_emb, (VOCAB, EMB_DIM), jnp.float32)
    emb = emb.at[0].set(0.0)                                  # padding_idx=0

    s_rnn = 1.0 / jnp.sqrt(jnp.float32(HIDDEN))
    w_ih = jax.random.uniform(k_ih, (EMB_DIM, HIDDEN), jnp.float32, -s_rnn, s_rnn)
    w_hh = jax.random.uniform(k_hh, (HIDDEN, HIDDEN), jnp.float32, -s_rnn, s_rnn)
    b_ih = jax.random.uniform(k_bih, (HIDDEN,), jnp.float32, -s_rnn, s_rnn)
    b_hh = jax.random.uniform(k_bhh, (HIDDEN,), jnp.float32, -s_rnn, s_rnn)

    s_cls = 1.0 / jnp.sqrt(jnp.float32(HIDDEN))
    w_out = jax.random.uniform(k_w, (HIDDEN, NUM_CLASSES), jnp.float32, -s_cls, s_cls)
    b_out = jax.random.uniform(k_b, (NUM_CLASSES,), jnp.float32, -s_cls, s_cls)

    tokens = jax.random.randint(k_tok, (BATCH, SEQ), 0, VOCAB, dtype=jnp.int32)

    ref = reference_forward(tokens, emb, w_ih, w_hh, b_ih, b_hh, w_out, b_out)

    # 1) f32-exact variant: tight check of gather / recurrence / classifier / softmax.
    params_f32 = prepare_params(emb, w_ih, w_hh, b_ih, b_hh, w_out, b_out,
                                compute_dtype=jnp.float32)
    probs_f32 = jax.block_until_ready(
        rnn_classifier_forward(tokens, params_f32, approx_softmax=False))
    assert probs_f32.shape == (BATCH, NUM_CLASSES)
    assert jnp.allclose(probs_f32, ref, atol=5e-5, rtol=5e-5)
    assert jnp.allclose(jnp.sum(probs_f32, axis=1), 1.0, atol=1e-5)

    # 2) Optimized variant (bf16 MXU operands + EUP approx reciprocal), looser tolerance.
    params_bf16 = prepare_params(emb, w_ih, w_hh, b_ih, b_hh, w_out, b_out,
                                 compute_dtype=jnp.bfloat16)
    probs = jax.block_until_ready(
        rnn_classifier_forward(tokens, params_bf16, approx_softmax=True))
    assert probs.shape == (BATCH, NUM_CLASSES)
    assert jnp.allclose(probs, ref, atol=2e-2, rtol=2e-2)
    assert jnp.allclose(jnp.sum(probs, axis=1), 1.0, atol=1e-2)

    print("KERNEL_OK")
</pallas_src>

<mosaic_0001>
module attributes {stable_mosaic.version = 11 : i64} {
  func.func @_rnn_classifier_kernel(%arg0: memref<4x8xi32, #tpu.memory_space<smem>>, %arg1: memref<32x1x128xf32, #tpu.memory_space<vmem>>, %arg2: memref<128x128xf32, #tpu.memory_space<vmem>>, %arg3: memref<128x128xf32, #tpu.memory_space<vmem>>, %arg4: memref<1x128xf32, #tpu.memory_space<vmem>>, %arg5: memref<8x128xf32, #tpu.memory_space<vmem>>, %arg6: memref<8x8x128xf32, #tpu.memory_space<vmem>>) attributes {dimension_semantics = [], scalar_prefetch = 0 : i64, scratch_operands = 1 : i64, tpu.core_type = #tpu.core_type<tc>} {
    %cst = arith.constant 0.000000e+00 : f32
    %0 = vector.broadcast %cst : f32 to vector<8x8x128xf32>
    %c0 = arith.constant 0 : index
    %c0_0 = arith.constant 0 : index
    %c0_1 = arith.constant 0 : index
    %1 = vector.load %arg6[%c0, %c0_0, %c0_1] : memref<8x8x128xf32, #tpu.memory_space<vmem>>, vector<8x8x128xf32>
    tpu.vector_store %arg6[%c0, %c0_0, %c0_1], %0 {strides = array<i32>} : memref<8x8x128xf32, #tpu.memory_space<vmem>>, vector<8x8x128xf32>,
    %c0_2 = arith.constant 0 : index
    %c0_3 = arith.constant 0 : index
    %2 = memref.load %arg0[%c0_2, %c0_3] : memref<4x8xi32, #tpu.memory_space<smem>>
    %3 = arith.index_cast %2 : i32 to index
    %c0_4 = arith.constant 0 : index
    %c0_5 = arith.constant 0 : index
    %4 = vector.load %arg1[%3, %c0_4, %c0_5] : memref<32x1x128xf32, #tpu.memory_space<vmem>>, vector<1x1x128xf32>
    %5 = vector.shape_cast %4 : vector<1x1x128xf32> to vector<1x128xf32>
    %c0_6 = arith.constant 0 : index
    %c0_7 = arith.constant 0 : index
    %c0_8 = arith.constant 0 : index
    %6 = vector.load %arg6[%c0_6, %c0_7, %c0_8] : memref<8x8x128xf32, #tpu.memory_space<vmem>>, vector<1x1x128xf32>
    %7 = vector.shape_cast %6 : vector<1x1x128xf32> to vector<1x128xf32>
    %8 = vector.shape_cast %5 : vector<1x128xf32> to vector<1x1x128xf32>
    tpu.vector_store %arg6[%c0_6, %c0_7, %c0_8], %8 {strides = array<i32>} : memref<8x8x128xf32, #tpu.memory_space<vmem>>, vector<1x1x128xf32>,
    %c1 = arith.constant 1 : index
    %c0_9 = arith.constant 0 : index
    %9 = memref.load %arg0[%c1, %c0_9] : memref<4x8xi32, #tpu.memory_space<smem>>
    %10 = arith.index_cast %9 : i32 to index
    %c0_10 = arith.constant 0 : index
    %c0_11 = arith.constant 0 : index
    %11 = vector.load %arg1[%10, %c0_10, %c0_11] : memref<32x1x128xf32, #tpu.memory_space<vmem>>, vector<1x1x128xf32>
    %12 = vector.shape_cast %11 : vector<1x1x128xf32> to vector<1x128xf32>
    %c0_12 = arith.constant 0 : index
    %c1_13 = arith.constant 1 : index
    %c0_14 = arith.constant 0 : index
    %13 = vector.load %arg6[%c0_12, %c1_13, %c0_14] : memref<8x8x128xf32, #tpu.memory_space<vmem>>, vector<1x1x128xf32>
    %14 = vector.shape_cast %13 : vector<1x1x128xf32> to vector<1x128xf32>
    %15 = vector.shape_cast %12 : vector<1x128xf32> to vector<1x1x128xf32>
    tpu.vector_store %arg6[%c0_12, %c1_13, %c0_14], %15 {strides = array<i32>} : memref<8x8x128xf32, #tpu.memory_space<vmem>>, vector<1x1x128xf32>,
    %c2 = arith.constant 2 : index
    %c0_15 = arith.constant 0 : index
    %16 = memref.load %arg0[%c2, %c0_15] : memref<4x8xi32, #tpu.memory_space<smem>>
    %17 = arith.index_cast %16 : i32 to index
    %c0_16 = arith.constant 0 : index
    %c0_17 = arith.constant 0 : index
    %18 = vector.load %arg1[%17, %c0_16, %c0_17] : memref<32x1x128xf32, #tpu.memory_space<vmem>>, vector<1x1x128xf32>
    %19 = vector.shape_cast %18 : vector<1x1x128xf32> to vector<1x128xf32>
    %c0_18 = arith.constant 0 : index
    %c2_19 = arith.constant 2 : index
    %c0_20 = arith.constant 0 : index
    %20 = vector.load %arg6[%c0_18, %c2_19, %c0_20] : memref<8x8x128xf32, #tpu.memory_space<vmem>>, vector<1x1x128xf32>
    %21 = vector.shape_cast %20 : vector<1x1x128xf32> to vector<1x128xf32>
    %22 = vector.shape_cast %19 : vector<1x128xf32> to vector<1x1x128xf32>
    tpu.vector_store %arg6[%c0_18, %c2_19, %c0_20], %22 {strides = array<i32>} : memref<8x8x128xf32, #tpu.memory_space<vmem>>, vector<1x1x128xf32>,
    %c3 = arith.constant 3 : index
    %c0_21 = arith.constant 0 : index
    %23 = memref.load %arg0[%c3, %c0_21] : memref<4x8xi32, #tpu.memory_space<smem>>
    %24 = arith.index_cast %23 : i32 to index
    %c0_22 = arith.constant 0 : index
    %c0_23 = arith.constant 0 : index
    %25 = vector.load %arg1[%24, %c0_22, %c0_23] : memref<32x1x128xf32, #tpu.memory_space<vmem>>, vector<1x1x128xf32>
    %26 = vector.shape_cast %25 : vector<1x1x128xf32> to vector<1x128xf32>
    %c0_24 = arith.constant 0 : index
    %c3_25 = arith.constant 3 : index
    %c0_26 = arith.constant 0 : index
    %27 = vector.load %arg6[%c0_24, %c3_25, %c0_26] : memref<8x8x128xf32, #tpu.memory_space<vmem>>, vector<1x1x128xf32>
    %28 = vector.shape_cast %27 : vector<1x1x128xf32> to vector<1x128xf32>
    %29 = vector.shape_cast %26 : vector<1x128xf32> to vector<1x1x128xf32>
    tpu.vector_store %arg6[%c0_24, %c3_25, %c0_26], %29 {strides = array<i32>} : memref<8x8x128xf32, #tpu.memory_space<vmem>>, vector<1x1x128xf32>,
    %c0_27 = arith.constant 0 : index
    %c1_28 = arith.constant 1 : index
    %30 = memref.load %arg0[%c0_27, %c1_28] : memref<4x8xi32, #tpu.memory_space<smem>>
    %31 = arith.index_cast %30 : i32 to index
    %c0_29 = arith.constant 0 : index
    %c0_30 = arith.constant 0 : index
    %32 = vector.load %arg1[%31, %c0_29, %c0_30] : memref<32x1x128xf32, #tpu.memory_space<vmem>>, vector<1x1x128xf32>
    %33 = vector.shape_cast %32 : vector<1x1x128xf32> to vector<1x128xf32>
    %c1_31 = arith.constant 1 : index
    %c0_32 = arith.constant 0 : index
    %c0_33 = arith.constant 0 : index
    %34 = vector.load %arg6[%c1_31, %c0_32, %c0_33] : memref<8x8x128xf32, #tpu.memory_space<vmem>>, vector<1x1x128xf32>
    %35 = vector.shape_cast %34 : vector<1x1x128xf32> to vector<1x128xf32>
    %36 = vector.shape_cast %33 : vector<1x128xf32> to vector<1x1x128xf32>
    tpu.vector_store %arg6[%c1_31, %c0_32, %c0_33], %36 {strides = array<i32>} : memref<8x8x128xf32, #tpu.memory_space<vmem>>, vector<1x1x128xf32>,
    %c1_34 = arith.constant 1 : index
    %c1_35 = arith.constant 1 : index
    %37 = memref.load %arg0[%c1_34, %c1_35] : memref<4x8xi32, #tpu.memory_space<smem>>
    %38 = arith.index_cast %37 : i32 to index
    %c0_36 = arith.constant 0 : index
    %c0_37 = arith.constant 0 : index
    %39 = vector.load %arg1[%38, %c0_36, %c0_37] : memref<32x1x128xf32, #tpu.memory_space<vmem>>, vector<1x1x128xf32>
    %40 = vector.shape_cast %39 : vector<1x1x128xf32> to vector<1x128xf32>
    %c1_38 = arith.constant 1 : index
    %c1_39 = arith.constant 1 : index
    %c0_40 = arith.constant 0 : index
    %41 = vector.load %arg6[%c1_38, %c1_39, %c0_40] : memref<8x8x128xf32, #tpu.memory_space<vmem>>, vector<1x1x128xf32>
    %42 = vector.shape_cast %41 : vector<1x1x128xf32> to vector<1x128xf32>
    %43 = vector.shape_cast %40 : vector<1x128xf32> to vector<1x1x128xf32>
    tpu.vector_store %arg6[%c1_38, %c1_39, %c0_40], %43 {strides = array<i32>} : memref<8x8x128xf32, #tpu.memory_space<vmem>>, vector<1x1x128xf32>,
    %c2_41 = arith.constant 2 : index
    %c1_42 = arith.constant 1 : index
    %44 = memref.load %arg0[%c2_41, %c1_42] : memref<4x8xi32, #tpu.memory_space<smem>>
    %45 = arith.index_cast %44 : i32 to index
    %c0_43 = arith.constant 0 : index
    %c0_44 = arith.constant 0 : index
    %46 = vector.load %arg1[%45, %c0_43, %c0_44] : memref<32x1x128xf32, #tpu.memory_space<vmem>>, vector<1x1x128xf32>
    %47 = vector.shape_cast %46 : vector<1x1x128xf32> to vector<1x128xf32>
    %c1_45 = arith.constant 1 : index
    %c2_46 = arith.constant 2 : index
    %c0_47 = arith.constant 0 : index
    %48 = vector.load %arg6[%c1_45, %c2_46, %c0_47] : memref<8x8x128xf32, #tpu.memory_space<vmem>>, vector<1x1x128xf32>
    %49 = vector.shape_cast %48 : vector<1x1x128xf32> to vector<1x128xf32>
    %50 = vector.shape_cast %47 : vector<1x128xf32> to vector<1x1x128xf32>
    tpu.vector_store %arg6[%c1_45, %c2_46, %c0_47], %50 {strides = array<i32>} : memref<8x8x128xf32, #tpu.memory_space<vmem>>, vector<1x1x128xf32>,
    %c3_48 = arith.constant 3 : index
    %c1_49 = arith.constant 1 : index
    %51 = memref.load %arg0[%c3_48, %c1_49] : memref<4x8xi32, #tpu.memory_space<smem>>
    %52 = arith.index_cast %51 : i32 to index
    %c0_50 = arith.constant 0 : index
    %c0_51 = arith.constant 0 : index
    %53 = vector.load %arg1[%52, %c0_50, %c0_51] : memref<32x1x128xf32, #tpu.memory_space<vmem>>, vector<1x1x128xf32>
    %54 = vector.shape_cast %53 : vector<1x1x128xf32> to vector<1x128xf32>
    %c1_52 = arith.constant 1 : index
    %c3_53 = arith.constant 3 : index
    %c0_54 = arith.constant 0 : index
    %55 = vector.load %arg6[%c1_52, %c3_53, %c0_54] : memref<8x8x128xf32, #tpu.memory_space<vmem>>, vector<1x1x128xf32>
    %56 = vector.shape_cast %55 : vector<1x1x128xf32> to vector<1x128xf32>
    %57 = vector.shape_cast %54 : vector<1x128xf32> to vector<1x1x128xf32>
    tpu.vector_store %arg6[%c1_52, %c3_53, %c0_54], %57 {strides = array<i32>} : memref<8x8x128xf32, #tpu.memory_space<vmem>>, vector<1x1x128xf32>,
    %c0_55 = arith.constant 0 : index
    %c2_56 = arith.constant 2 : index
    %58 = memref.load %arg0[%c0_55, %c2_56] : memref<4x8xi32, #tpu.memory_space<smem>>
    %59 = arith.index_cast %58 : i32 to index
    %c0_57 = arith.constant 0 : index
    %c0_58 = arith.constant 0 : index
    %60 = vector.load %arg1[%59, %c0_57, %c0_58] : memref<32x1x128xf32, #tpu.memory_space<vmem>>, vector<1x1x128xf32>
    %61 = vector.shape_cast %60 : vector<1x1x128xf32> to vector<1x128xf32>
    %c2_59 = arith.constant 2 : index
    %c0_60 = arith.constant 0 : index
    %c0_61 = arith.constant 0 : index
    %62 = vector.load %arg6[%c2_59, %c0_60, %c0_61] : memref<8x8x128xf32, #tpu.memory_space<vmem>>, vector<1x1x128xf32>
    %63 = vector.shape_cast %62 : vector<1x1x128xf32> to vector<1x128xf32>
    %64 = vector.shape_cast %61 : vector<1x128xf32> to vector<1x1x128xf32>
    tpu.vector_store %arg6[%c2_59, %c0_60, %c0_61], %64 {strides = array<i32>} : memref<8x8x128xf32, #tpu.memory_space<vmem>>, vector<1x1x128xf32>,
    %c1_62 = arith.constant 1 : index
    %c2_63 = arith.constant 2 : index
    %65 = memref.load %arg0[%c1_62, %c2_63] : memref<4x8xi32, #tpu.memory_space<smem>>
    %66 = arith.index_cast %65 : i32 to index
    %c0_64 = arith.constant 0 : index
    %c0_65 = arith.constant 0 : index
    %67 = vector.load %arg1[%66, %c0_64, %c0_65] : memref<32x1x128xf32, #tpu.memory_space<vmem>>, vector<1x1x128xf32>
    %68 = vector.shape_cast %67 : vector<1x1x128xf32> to vector<1x128xf32>
    %c2_66 = arith.constant 2 : index
    %c1_67 = arith.constant 1 : index
    %c0_68 = arith.constant 0 : index
    %69 = vector.load %arg6[%c2_66, %c1_67, %c0_68] : memref<8x8x128xf32, #tpu.memory_space<vmem>>, vector<1x1x128xf32>
    %70 = vector.shape_cast %69 : vector<1x1x128xf32> to vector<1x128xf32>
    %71 = vector.shape_cast %68 : vector<1x128xf32> to vector<1x1x128xf32>
    tpu.vector_store %arg6[%c2_66, %c1_67, %c0_68], %71 {strides = array<i32>} : memref<8x8x128xf32, #tpu.memory_space<vmem>>, vector<1x1x128xf32>,
    %c2_69 = arith.constant 2 : index
    %c2_70 = arith.constant 2 : index
    %72 = memref.load %arg0[%c2_69, %c2_70] : memref<4x8xi32, #tpu.memory_space<smem>>
    %73 = arith.index_cast %72 : i32 to index
    %c0_71 = arith.constant 0 : index
    %c0_72 = arith.constant 0 : index
    %74 = vector.load %arg1[%73, %c0_71, %c0_72] : memref<32x1x128xf32, #tpu.memory_space<vmem>>, vector<1x1x128xf32>
    %75 = vector.shape_cast %74 : vector<1x1x128xf32> to vector<1x128xf32>
    %c2_73 = arith.constant 2 : index
    %c2_74 = arith.constant 2 : index
    %c0_75 = arith.constant 0 : index
    %76 = vector.load %arg6[%c2_73, %c2_74, %c0_75] : memref<8x8x128xf32, #tpu.memory_space<vmem>>, vector<1x1x128xf32>
    %77 = vector.shape_cast %76 : vector<1x1x128xf32> to vector<1x128xf32>
    %78 = vector.shape_cast %75 : vector<1x128xf32> to vector<1x1x128xf32>
    tpu.vector_store %arg6[%c2_73, %c2_74, %c0_75], %78 {strides = array<i32>} : memref<8x8x128xf32, #tpu.memory_space<vmem>>, vector<1x1x128xf32>,
    %c3_76 = arith.constant 3 : index
    %c2_77 = arith.constant 2 : index
    %79 = memref.load %arg0[%c3_76, %c2_77] : memref<4x8xi32, #tpu.memory_space<smem>>
    %80 = arith.index_cast %79 : i32 to index
    %c0_78 = arith.constant 0 : index
    %c0_79 = arith.constant 0 : index
    %81 = vector.load %arg1[%80, %c0_78, %c0_79] : memref<32x1x128xf32, #tpu.memory_space<vmem>>, vector<1x1x128xf32>
    %82 = vector.shape_cast %81 : vector<1x1x128xf32> to vector<1x128xf32>
    %c2_80 = arith.constant 2 : index
    %c3_81 = arith.constant 3 : index
    %c0_82 = arith.constant 0 : index
    %83 = vector.load %arg6[%c2_80, %c3_81, %c0_82] : memref<8x8x128xf32, #tpu.memory_space<vmem>>, vector<1x1x128xf32>
    %84 = vector.shape_cast %83 : vector<1x1x128xf32> to vector<1x128xf32>
    %85 = vector.shape_cast %82 : vector<1x128xf32> to vector<1x1x128xf32>
    tpu.vector_store %arg6[%c2_80, %c3_81, %c0_82], %85 {strides = array<i32>} : memref<8x8x128xf32, #tpu.memory_space<vmem>>, vector<1x1x128xf32>,
    %c0_83 = arith.constant 0 : index
    %c3_84 = arith.constant 3 : index
    %86 = memref.load %arg0[%c0_83, %c3_84] : memref<4x8xi32, #tpu.memory_space<smem>>
    %87 = arith.index_cast %86 : i32 to index
    %c0_85 = arith.constant 0 : index
    %c0_86 = arith.constant 0 : index
    %88 = vector.load %arg1[%87, %c0_85, %c0_86] : memref<32x1x128xf32, #tpu.memory_space<vmem>>, vector<1x1x128xf32>
    %89 = vector.shape_cast %88 : vector<1x1x128xf32> to vector<1x128xf32>
    %c3_87 = arith.constant 3 : index
    %c0_88 = arith.constant 0 : index
    %c0_89 = arith.constant 0 : index
    %90 = vector.load %arg6[%c3_87, %c0_88, %c0_89] : memref<8x8x128xf32, #tpu.memory_space<vmem>>, vector<1x1x128xf32>
    %91 = vector.shape_cast %90 : vector<1x1x128xf32> to vector<1x128xf32>
    %92 = vector.shape_cast %89 : vector<1x128xf32> to vector<1x1x128xf32>
    tpu.vector_store %arg6[%c3_87, %c0_88, %c0_89], %92 {strides = array<i32>} : memref<8x8x128xf32, #tpu.memory_space<vmem>>, vector<1x1x128xf32>,
    %c1_90 = arith.constant 1 : index
    %c3_91 = arith.constant 3 : index
    %93 = memref.load %arg0[%c1_90, %c3_91] : memref<4x8xi32, #tpu.memory_space<smem>>
    %94 = arith.index_cast %93 : i32 to index
    %c0_92 = arith.constant 0 : index
    %c0_93 = arith.constant 0 : index
    %95 = vector.load %arg1[%94, %c0_92, %c0_93] : memref<32x1x128xf32, #tpu.memory_space<vmem>>, vector<1x1x128xf32>
    %96 = vector.shape_cast %95 : vector<1x1x128xf32> to vector<1x128xf32>
    %c3_94 = arith.constant 3 : index
    %c1_95 = arith.constant 1 : index
    %c0_96 = arith.constant 0 : index
    %97 = vector.load %arg6[%c3_94, %c1_95, %c0_96] : memref<8x8x128xf32, #tpu.memory_space<vmem>>, vector<1x1x128xf32>
    %98 = vector.shape_cast %97 : vector<1x1x128xf32> to vector<1x128xf32>
    %99 = vector.shape_cast %96 : vector<1x128xf32> to vector<1x1x128xf32>
    tpu.vector_store %arg6[%c3_94, %c1_95, %c0_96], %99 {strides = array<i32>} : memref<8x8x128xf32, #tpu.memory_space<vmem>>, vector<1x1x128xf32>,
    %c2_97 = arith.constant 2 : index
    %c3_98 = arith.constant 3 : index
    %100 = memref.load %arg0[%c2_97, %c3_98] : memref<4x8xi32, #tpu.memory_space<smem>>
    %101 = arith.index_cast %100 : i32 to index
    %c0_99 = arith.constant 0 : index
    %c0_100 = arith.constant 0 : index
    %102 = vector.load %arg1[%101, %c0_99, %c0_100] : memref<32x1x128xf32, #tpu.memory_space<vmem>>, vector<1x1x128xf32>
    %103 = vector.shape_cast %102 : vector<1x1x128xf32> to vector<1x128xf32>
    %c3_101 = arith.constant 3 : index
    %c2_102 = arith.constant 2 : index
    %c0_103 = arith.constant 0 : index
    %104 = vector.load %arg6[%c3_101, %c2_102, %c0_103] : memref<8x8x128xf32, #tpu.memory_space<vmem>>, vector<1x1x128xf32>
    %105 = vector.shape_cast %104 : vector<1x1x128xf32> to vector<1x128xf32>
    %106 = vector.shape_cast %103 : vector<1x128xf32> to vector<1x1x128xf32>
    tpu.vector_store %arg6[%c3_101, %c2_102, %c0_103], %106 {strides = array<i32>} : memref<8x8x128xf32, #tpu.memory_space<vmem>>, vector<1x1x128xf32>,
    %c3_104 = arith.constant 3 : index
    %c3_105 = arith.constant 3 : index
    %107 = memref.load %arg0[%c3_104, %c3_105] : memref<4x8xi32, #tpu.memory_space<smem>>
    %108 = arith.index_cast %107 : i32 to index
    %c0_106 = arith.constant 0 : index
    %c0_107 = arith.constant 0 : index
    %109 = vector.load %arg1[%108, %c0_106, %c0_107] : memref<32x1x128xf32, #tpu.memory_space<vmem>>, vector<1x1x128xf32>
    %110 = vector.shape_cast %109 : vector<1x1x128xf32> to vector<1x128xf32>
    %c3_108 = arith.constant 3 : index
    %c3_109 = arith.constant 3 : index
    %c0_110 = arith.constant 0 : index
    %111 = vector.load %arg6[%c3_108, %c3_109, %c0_110] : memref<8x8x128xf32, #tpu.memory_space<vmem>>, vector<1x1x128xf32>
    %112 = vector.shape_cast %111 : vector<1x1x128xf32> to vector<1x128xf32>
    %113 = vector.shape_cast %110 : vector<1x128xf32> to vector<1x1x128xf32>
    tpu.vector_store %arg6[%c3_108, %c3_109, %c0_110], %113 {strides = array<i32>} : memref<8x8x128xf32, #tpu.memory_space<vmem>>, vector<1x1x128xf32>,
    %c0_111 = arith.constant 0 : index
    %c4 = arith.constant 4 : index
    %114 = memref.load %arg0[%c0_111, %c4] : memref<4x8xi32, #tpu.memory_space<smem>>
    %115 = arith.index_cast %114 : i32 to index
    %c0_112 = arith.constant 0 : index
    %c0_113 = arith.constant 0 : index
    %116 = vector.load %arg1[%115, %c0_112, %c0_113] : memref<32x1x128xf32, #tpu.memory_space<vmem>>, vector<1x1x128xf32>
    %117 = vector.shape_cast %116 : vector<1x1x128xf32> to vector<1x128xf32>
    %c4_114 = arith.constant 4 : index
    %c0_115 = arith.constant 0 : index
    %c0_116 = arith.constant 0 : index
    %118 = vector.load %arg6[%c4_114, %c0_115, %c0_116] : memref<8x8x128xf32, #tpu.memory_space<vmem>>, vector<1x1x128xf32>
    %119 = vector.shape_cast %118 : vector<1x1x128xf32> to vector<1x128xf32>
    %120 = vector.shape_cast %117 : vector<1x128xf32> to vector<1x1x128xf32>
    tpu.vector_store %arg6[%c4_114, %c0_115, %c0_116], %120 {strides = array<i32>} : memref<8x8x128xf32, #tpu.memory_space<vmem>>, vector<1x1x128xf32>,
    %c1_117 = arith.constant 1 : index
    %c4_118 = arith.constant 4 : index
    %121 = memref.load %arg0[%c1_117, %c4_118] : memref<4x8xi32, #tpu.memory_space<smem>>
    %122 = arith.index_cast %121 : i32 to index
    %c0_119 = arith.constant 0 : index
    %c0_120 = arith.constant 0 : index
    %123 = vector.load %arg1[%122, %c0_119, %c0_120] : memref<32x1x128xf32, #tpu.memory_space<vmem>>, vector<1x1x128xf32>
    %124 = vector.shape_cast %123 : vector<1x1x128xf32> to vector<1x128xf32>
    %c4_121 = arith.constant 4 : index
    %c1_122 = arith.constant 1 : index
    %c0_123 = arith.constant 0 : index
    %125 = vector.load %arg6[%c4_121, %c1_122, %c0_123] : memref<8x8x128xf32, #tpu.memory_space<vmem>>, vector<1x1x128xf32>
    %126 = vector.shape_cast %125 : vector<1x1x128xf32> to vector<1x128xf32>
    %127 = vector.shape_cast %124 : vector<1x128xf32> to vector<1x1x128xf32>
    tpu.vector_store %arg6[%c4_121, %c1_122, %c0_123], %127 {strides = array<i32>} : memref<8x8x128xf32, #tpu.memory_space<vmem>>, vector<1x1x128xf32>,
    %c2_124 = arith.constant 2 : index
    %c4_125 = arith.constant 4 : index
    %128 = memref.load %arg0[%c2_124, %c4_125] : memref<4x8xi32, #tpu.memory_space<smem>>
    %129 = arith.index_cast %128 : i32 to index
    %c0_126 = arith.constant 0 : index
    %c0_127 = arith.constant 0 : index
    %130 = vector.load %arg1[%129, %c0_126, %c0_127] : memref<32x1x128xf32, #tpu.memory_space<vmem>>, vector<1x1x128xf32>
    %131 = vector.shape_cast %130 : vector<1x1x128xf32> to vector<1x128xf32>
    %c4_128 = arith.constant 4 : index
    %c2_129 = arith.constant 2 : index
    %c0_130 = arith.constant 0 : index
    %132 = vector.load %arg6[%c4_128, %c2_129, %c0_130] : memref<8x8x128xf32, #tpu.memory_space<vmem>>, vector<1x1x128xf32>
    %133 = vector.shape_cast %132 : vector<1x1x128xf32> to vector<1x128xf32>
    %134 = vector.shape_cast %131 : vector<1x128xf32> to vector<1x1x128xf32>
    tpu.vector_store %arg6[%c4_128, %c2_129, %c0_130], %134 {strides = array<i32>} : memref<8x8x128xf32, #tpu.memory_space<vmem>>, vector<1x1x128xf32>,
    %c3_131 = arith.constant 3 : index
    %c4_132 = arith.constant 4 : index
    %135 = memref.load %arg0[%c3_131, %c4_132] : memref<4x8xi32, #tpu.memory_space<smem>>
    %136 = arith.index_cast %135 : i32 to index
    %c0_133 = arith.constant 0 : index
    %c0_134 = arith.constant 0 : index
    %137 = vector.load %arg1[%136, %c0_133, %c0_134] : memref<32x1x128xf32, #tpu.memory_space<vmem>>, vector<1x1x128xf32>
    %138 = vector.shape_cast %137 : vector<1x1x128xf32> to vector<1x128xf32>
    %c4_135 = arith.constant 4 : index
    %c3_136 = arith.constant 3 : index
    %c0_137 = arith.constant 0 : index
    %139 = vector.load %arg6[%c4_135, %c3_136, %c0_137] : memref<8x8x128xf32, #tpu.memory_space<vmem>>, vector<1x1x128xf32>
    %140 = vector.shape_cast %139 : vector<1x1x128xf32> to vector<1x128xf32>
    %141 = vector.shape_cast %138 : vector<1x128xf32> to vector<1x1x128xf32>
    tpu.vector_store %arg6[%c4_135, %c3_136, %c0_137], %141 {strides = array<i32>} : memref<8x8x128xf32, #tpu.memory_space<vmem>>, vector<1x1x128xf32>,
    %c0_138 = arith.constant 0 : index
    %c5 = arith.constant 5 : index
    %142 = memref.load %arg0[%c0_138, %c5] : memref<4x8xi32, #tpu.memory_space<smem>>
    %143 = arith.index_cast %142 : i32 to index
    %c0_139 = arith.constant 0 : index
    %c0_140 = arith.constant 0 : index
    %144 = vector.load %arg1[%143, %c0_139, %c0_140] : memref<32x1x128xf32, #tpu.memory_space<vmem>>, vector<1x1x128xf32>
    %145 = vector.shape_cast %144 : vector<1x1x128xf32> to vector<1x128xf32>
    %c5_141 = arith.constant 5 : index
    %c0_142 = arith.constant 0 : index
    %c0_143 = arith.constant 0 : index
    %146 = vector.load %arg6[%c5_141, %c0_142, %c0_143] : memref<8x8x128xf32, #tpu.memory_space<vmem>>, vector<1x1x128xf32>
    %147 = vector.shape_cast %146 : vector<1x1x128xf32> to vector<1x128xf32>
    %148 = vector.shape_cast %145 : vector<1x128xf32> to vector<1x1x128xf32>
    tpu.vector_store %arg6[%c5_141, %c0_142, %c0_143], %148 {strides = array<i32>} : memref<8x8x128xf32, #tpu.memory_space<vmem>>, vector<1x1x128xf32>,
    %c1_144 = arith.constant 1 : index
    %c5_145 = arith.constant 5 : index
    %149 = memref.load %arg0[%c1_144, %c5_145] : memref<4x8xi32, #tpu.memory_space<smem>>
    %150 = arith.index_cast %149 : i32 to index
    %c0_146 = arith.constant 0 : index
    %c0_147 = arith.constant 0 : index
    %151 = vector.load %arg1[%150, %c0_146, %c0_147] : memref<32x1x128xf32, #tpu.memory_space<vmem>>, vector<1x1x128xf32>
    %152 = vector.shape_cast %151 : vector<1x1x128xf32> to vector<1x128xf32>
    %c5_148 = arith.constant 5 : index
    %c1_149 = arith.constant 1 : index
    %c0_150 = arith.constant 0 : index
    %153 = vector.load %arg6[%c5_148, %c1_149, %c0_150] : memref<8x8x128xf32, #tpu.memory_space<vmem>>, vector<1x1x128xf32>
    %154 = vector.shape_cast %153 : vector<1x1x128xf32> to vector<1x128xf32>
    %155 = vector.shape_cast %152 : vector<1x128xf32> to vector<1x1x128xf32>
    tpu.vector_store %arg6[%c5_148, %c1_149, %c0_150], %155 {strides = array<i32>} : memref<8x8x128xf32, #tpu.memory_space<vmem>>, vector<1x1x128xf32>,
    %c2_151 = arith.constant 2 : index
    %c5_152 = arith.constant 5 : index
    %156 = memref.load %arg0[%c2_151, %c5_152] : memref<4x8xi32, #tpu.memory_space<smem>>
    %157 = arith.index_cast %156 : i32 to index
    %c0_153 = arith.constant 0 : index
    %c0_154 = arith.constant 0 : index
    %158 = vector.load %arg1[%157, %c0_153, %c0_154] : memref<32x1x128xf32, #tpu.memory_space<vmem>>, vector<1x1x128xf32>
    %159 = vector.shape_cast %158 : vector<1x1x128xf32> to vector<1x128xf32>
    %c5_155 = arith.constant 5 : index
    %c2_156 = arith.constant 2 : index
    %c0_157 = arith.constant 0 : index
    %160 = vector.load %arg6[%c5_155, %c2_156, %c0_157] : memref<8x8x128xf32, #tpu.memory_space<vmem>>, vector<1x1x128xf32>
    %161 = vector.shape_cast %160 : vector<1x1x128xf32> to vector<1x128xf32>
    %162 = vector.shape_cast %159 : vector<1x128xf32> to vector<1x1x128xf32>
    tpu.vector_store %arg6[%c5_155, %c2_156, %c0_157], %162 {strides = array<i32>} : memref<8x8x128xf32, #tpu.memory_space<vmem>>, vector<1x1x128xf32>,
    %c3_158 = arith.constant 3 : index
    %c5_159 = arith.constant 5 : index
    %163 = memref.load %arg0[%c3_158, %c5_159] : memref<4x8xi32, #tpu.memory_space<smem>>
    %164 = arith.index_cast %163 : i32 to index
    %c0_160 = arith.constant 0 : index
    %c0_161 = arith.constant 0 : index
    %165 = vector.load %arg1[%164, %c0_160, %c0_161] : memref<32x1x128xf32, #tpu.memory_space<vmem>>, vector<1x1x128xf32>
    %166 = vector.shape_cast %165 : vector<1x1x128xf32> to vector<1x128xf32>
    %c5_162 = arith.constant 5 : index
    %c3_163 = arith.constant 3 : index
    %c0_164 = arith.constant 0 : index
    %167 = vector.load %arg6[%c5_162, %c3_163, %c0_164] : memref<8x8x128xf32, #tpu.memory_space<vmem>>, vector<1x1x128xf32>
    %168 = vector.shape_cast %167 : vector<1x1x128xf32> to vector<1x128xf32>
    %169 = vector.shape_cast %166 : vector<1x128xf32> to vector<1x1x128xf32>
    tpu.vector_store %arg6[%c5_162, %c3_163, %c0_164], %169 {strides = array<i32>} : memref<8x8x128xf32, #tpu.memory_space<vmem>>, vector<1x1x128xf32>,
    %c0_165 = arith.constant 0 : index
    %c6 = arith.constant 6 : index
    %170 = memref.load %arg0[%c0_165, %c6] : memref<4x8xi32, #tpu.memory_space<smem>>
    %171 = arith.index_cast %170 : i32 to index
    %c0_166 = arith.constant 0 : index
    %c0_167 = arith.constant 0 : index
    %172 = vector.load %arg1[%171, %c0_166, %c0_167] : memref<32x1x128xf32, #tpu.memory_space<vmem>>, vector<1x1x128xf32>
    %173 = vector.shape_cast %172 : vector<1x1x128xf32> to vector<1x128xf32>
    %c6_168 = arith.constant 6 : index
    %c0_169 = arith.constant 0 : index
    %c0_170 = arith.constant 0 : index
    %174 = vector.load %arg6[%c6_168, %c0_169, %c0_170] : memref<8x8x128xf32, #tpu.memory_space<vmem>>, vector<1x1x128xf32>
    %175 = vector.shape_cast %174 : vector<1x1x128xf32> to vector<1x128xf32>
    %176 = vector.shape_cast %173 : vector<1x128xf32> to vector<1x1x128xf32>
    tpu.vector_store %arg6[%c6_168, %c0_169, %c0_170], %176 {strides = array<i32>} : memref<8x8x128xf32, #tpu.memory_space<vmem>>, vector<1x1x128xf32>,
    %c1_171 = arith.constant 1 : index
    %c6_172 = arith.constant 6 : index
    %177 = memref.load %arg0[%c1_171, %c6_172] : memref<4x8xi32, #tpu.memory_space<smem>>
    %178 = arith.index_cast %177 : i32 to index
    %c0_173 = arith.constant 0 : index
    %c0_174 = arith.constant 0 : index
    %179 = vector.load %arg1[%178, %c0_173, %c0_174] : memref<32x1x128xf32, #tpu.memory_space<vmem>>, vector<1x1x128xf32>
    %180 = vector.shape_cast %179 : vector<1x1x128xf32> to vector<1x128xf32>
    %c6_175 = arith.constant 6 : index
    %c1_176 = arith.constant 1 : index
    %c0_177 = arith.constant 0 : index
    %181 = vector.load %arg6[%c6_175, %c1_176, %c0_177] : memref<8x8x128xf32, #tpu.memory_space<vmem>>, vector<1x1x128xf32>
    %182 = vector.shape_cast %181 : vector<1x1x128xf32> to vector<1x128xf32>
    %183 = vector.shape_cast %180 : vector<1x128xf32> to vector<1x1x128xf32>
    tpu.vector_store %arg6[%c6_175, %c1_176, %c0_177], %183 {strides = array<i32>} : memref<8x8x128xf32, #tpu.memory_space<vmem>>, vector<1x1x128xf32>,
    %c2_178 = arith.constant 2 : index
    %c6_179 = arith.constant 6 : index
    %184 = memref.load %arg0[%c2_178, %c6_179] : memref<4x8xi32, #tpu.memory_space<smem>>
    %185 = arith.index_cast %184 : i32 to index
    %c0_180 = arith.constant 0 : index
    %c0_181 = arith.constant 0 : index
    %186 = vector.load %arg1[%185, %c0_180, %c0_181] : memref<32x1x128xf32, #tpu.memory_space<vmem>>, vector<1x1x128xf32>
    %187 = vector.shape_cast %186 : vector<1x1x128xf32> to vector<1x128xf32>
    %c6_182 = arith.constant 6 : index
    %c2_183 = arith.constant 2 : index
    %c0_184 = arith.constant 0 : index
    %188 = vector.load %arg6[%c6_182, %c2_183, %c0_184] : memref<8x8x128xf32, #tpu.memory_space<vmem>>, vector<1x1x128xf32>
    %189 = vector.shape_cast %188 : vector<1x1x128xf32> to vector<1x128xf32>
    %190 = vector.shape_cast %187 : vector<1x128xf32> to vector<1x1x128xf32>
    tpu.vector_store %arg6[%c6_182, %c2_183, %c0_184], %190 {strides = array<i32>} : memref<8x8x128xf32, #tpu.memory_space<vmem>>, vector<1x1x128xf32>,
    %c3_185 = arith.constant 3 : index
    %c6_186 = arith.constant 6 : index
    %191 = memref.load %arg0[%c3_185, %c6_186] : memref<4x8xi32, #tpu.memory_space<smem>>
    %192 = arith.index_cast %191 : i32 to index
    %c0_187 = arith.constant 0 : index
    %c0_188 = arith.constant 0 : index
    %193 = vector.load %arg1[%192, %c0_187, %c0_188] : memref<32x1x128xf32, #tpu.memory_space<vmem>>, vector<1x1x128xf32>
    %194 = vector.shape_cast %193 : vector<1x1x128xf32> to vector<1x128xf32>
    %c6_189 = arith.constant 6 : index
    %c3_190 = arith.constant 3 : index
    %c0_191 = arith.constant 0 : index
    %195 = vector.load %arg6[%c6_189, %c3_190, %c0_191] : memref<8x8x128xf32, #tpu.memory_space<vmem>>, vector<1x1x128xf32>
    %196 = vector.shape_cast %195 : vector<1x1x128xf32> to vector<1x128xf32>
    %197 = vector.shape_cast %194 : vector<1x128xf32> to vector<1x1x128xf32>
    tpu.vector_store %arg6[%c6_189, %c3_190, %c0_191], %197 {strides = array<i32>} : memref<8x8x128xf32, #tpu.memory_space<vmem>>, vector<1x1x128xf32>,
    %c0_192 = arith.constant 0 : index
    %c7 = arith.constant 7 : index
    %198 = memref.load %arg0[%c0_192, %c7] : memref<4x8xi32, #tpu.memory_space<smem>>
    %199 = arith.index_cast %198 : i32 to index
    %c0_193 = arith.constant 0 : index
    %c0_194 = arith.constant 0 : index
    %200 = vector.load %arg1[%199, %c0_193, %c0_194] : memref<32x1x128xf32, #tpu.memory_space<vmem>>, vector<1x1x128xf32>
    %201 = vector.shape_cast %200 : vector<1x1x128xf32> to vector<1x128xf32>
    %c7_195 = arith.constant 7 : index
    %c0_196 = arith.constant 0 : index
    %c0_197 = arith.constant 0 : index
    %202 = vector.load %arg6[%c7_195, %c0_196, %c0_197] : memref<8x8x128xf32, #tpu.memory_space<vmem>>, vector<1x1x128xf32>
    %203 = vector.shape_cast %202 : vector<1x1x128xf32> to vector<1x128xf32>
    %204 = vector.shape_cast %201 : vector<1x128xf32> to vector<1x1x128xf32>
    tpu.vector_store %arg6[%c7_195, %c0_196, %c0_197], %204 {strides = array<i32>} : memref<8x8x128xf32, #tpu.memory_space<vmem>>, vector<1x1x128xf32>,
    %c1_198 = arith.constant 1 : index
    %c7_199 = arith.constant 7 : index
    %205 = memref.load %arg0[%c1_198, %c7_199] : memref<4x8xi32, #tpu.memory_space<smem>>
    %206 = arith.index_cast %205 : i32 to index
    %c0_200 = arith.constant 0 : index
    %c0_201 = arith.constant 0 : index
    %207 = vector.load %arg1[%206, %c0_200, %c0_201] : memref<32x1x128xf32, #tpu.memory_space<vmem>>, vector<1x1x128xf32>
    %208 = vector.shape_cast %207 : vector<1x1x128xf32> to vector<1x128xf32>
    %c7_202 = arith.constant 7 : index
    %c1_203 = arith.constant 1 : index
    %c0_204 = arith.constant 0 : index
    %209 = vector.load %arg6[%c7_202, %c1_203, %c0_204] : memref<8x8x128xf32, #tpu.memory_space<vmem>>, vector<1x1x128xf32>
    %210 = vector.shape_cast %209 : vector<1x1x128xf32> to vector<1x128xf32>
    %211 = vector.shape_cast %208 : vector<1x128xf32> to vector<1x1x128xf32>
    tpu.vector_store %arg6[%c7_202, %c1_203, %c0_204], %211 {strides = array<i32>} : memref<8x8x128xf32, #tpu.memory_space<vmem>>, vector<1x1x128xf32>,
    %c2_205 = arith.constant 2 : index
    %c7_206 = arith.constant 7 : index
    %212 = memref.load %arg0[%c2_205, %c7_206] : memref<4x8xi32, #tpu.memory_space<smem>>
    %213 = arith.index_cast %212 : i32 to index
    %c0_207 = arith.constant 0 : index
    %c0_208 = arith.constant 0 : index
    %214 = vector.load %arg1[%213, %c0_207, %c0_208] : memref<32x1x128xf32, #tpu.memory_space<vmem>>, vector<1x1x128xf32>
    %215 = vector.shape_cast %214 : vector<1x1x128xf32> to vector<1x128xf32>
    %c7_209 = arith.constant 7 : index
    %c2_210 = arith.constant 2 : index
    %c0_211 = arith.constant 0 : index
    %216 = vector.load %arg6[%c7_209, %c2_210, %c0_211] : memref<8x8x128xf32, #tpu.memory_space<vmem>>, vector<1x1x128xf32>
    %217 = vector.shape_cast %216 : vector<1x1x128xf32> to vector<1x128xf32>
    %218 = vector.shape_cast %215 : vector<1x128xf32> to vector<1x1x128xf32>
    tpu.vector_store %arg6[%c7_209, %c2_210, %c0_211], %218 {strides = array<i32>} : memref<8x8x128xf32, #tpu.memory_space<vmem>>, vector<1x1x128xf32>,
    %c3_212 = arith.constant 3 : index
    %c7_213 = arith.constant 7 : index
    %219 = memref.load %arg0[%c3_212, %c7_213] : memref<4x8xi32, #tpu.memory_space<smem>>
    %220 = arith.index_cast %219 : i32 to index
    %c0_214 = arith.constant 0 : index
    %c0_215 = arith.constant 0 : index
    %221 = vector.load %arg1[%220, %c0_214, %c0_215] : memref<32x1x128xf32, #tpu.memory_space<vmem>>, vector<1x1x128xf32>
    %222 = vector.shape_cast %221 : vector<1x1x128xf32> to vector<1x128xf32>
    %c7_216 = arith.constant 7 : index
    %c3_217 = arith.constant 3 : index
    %c0_218 = arith.constant 0 : index
    %223 = vector.load %arg6[%c7_216, %c3_217, %c0_218] : memref<8x8x128xf32, #tpu.memory_space<vmem>>, vector<1x1x128xf32>
    %224 = vector.shape_cast %223 : vector<1x1x128xf32> to vector<1x128xf32>
    %225 = vector.shape_cast %222 : vector<1x128xf32> to vector<1x1x128xf32>
    tpu.vector_store %arg6[%c7_216, %c3_217, %c0_218], %225 {strides = array<i32>} : memref<8x8x128xf32, #tpu.memory_space<vmem>>, vector<1x1x128xf32>,
    %cst_219 = arith.constant 0.000000e+00 : f32
    %226 = vector.broadcast %cst_219 : f32 to vector<8x128xf32>
    %c0_i32 = arith.constant 0 : i32
    %227 = arith.index_cast %c0_i32 : i32 to index
    %c0_220 = arith.constant 0 : index
    %c0_221 = arith.constant 0 : index
    %228 = vector.load %arg6[%227, %c0_220, %c0_221] : memref<8x8x128xf32, #tpu.memory_space<vmem>>, vector<1x8x128xf32>
    %229 = vector.shape_cast %228 : vector<1x8x128xf32> to vector<8x128xf32>
    %c0_222 = arith.constant 0 : index
    %c0_223 = arith.constant 0 : index
    %230 = vector.load %arg2[%c0_222, %c0_223] : memref<128x128xf32, #tpu.memory_space<vmem>>, vector<128x128xf32>
    %cst_224 = arith.constant dense<0.000000e+00> : vector<8x128xf32>
    %231 = tpu.matmul %226, %230, %cst_224 {dimension_numbers = #tpu.dot_dimension_numbers<[1], [0], [0], [1], [0, 0, 1, 1], [], []>} : vector<8x128xf32>, vector<128x128xf32>, vector<8x128xf32> -> vector<8x128xf32>
    %232 = arith.addf %229, %231 : vector<8x128xf32>
    %233 = math.tanh %232 : vector<8x128xf32>
    %c1_i32 = arith.constant 1 : i32
    %234 = arith.index_cast %c1_i32 : i32 to index
    %c0_225 = arith.constant 0 : index
    %c0_226 = arith.constant 0 : index
    %235 = vector.load %arg6[%234, %c0_225, %c0_226] : memref<8x8x128xf32, #tpu.memory_space<vmem>>, vector<1x8x128xf32>
    %236 = vector.shape_cast %235 : vector<1x8x128xf32> to vector<8x128xf32>
    %c0_227 = arith.constant 0 : index
    %c0_228 = arith.constant 0 : index
    %237 = vector.load %arg2[%c0_227, %c0_228] : memref<128x128xf32, #tpu.memory_space<vmem>>, vector<128x128xf32>
    %cst_229 = arith.constant dense<0.000000e+00> : vector<8x128xf32>
    %238 = tpu.matmul %233, %237, %cst_229 {dimension_numbers = #tpu.dot_dimension_numbers<[1], [0], [0], [1], [0, 0, 1, 1], [], []>} : vector<8x128xf32>, vector<128x128xf32>, vector<8x128xf32> -> vector<8x128xf32>
    %239 = arith.addf %236, %238 : vector<8x128xf32>
    %240 = math.tanh %239 : vector<8x128xf32>
    %c2_i32 = arith.constant 2 : i32
    %241 = arith.index_cast %c2_i32 : i32 to index
    %c0_230 = arith.constant 0 : index
    %c0_231 = arith.constant 0 : index
    %242 = vector.load %arg6[%241, %c0_230, %c0_231] : memref<8x8x128xf32, #tpu.memory_space<vmem>>, vector<1x8x128xf32>
    %243 = vector.shape_cast %242 : vector<1x8x128xf32> to vector<8x128xf32>
    %c0_232 = arith.constant 0 : index
    %c0_233 = arith.constant 0 : index
    %244 = vector.load %arg2[%c0_232, %c0_233] : memref<128x128xf32, #tpu.memory_space<vmem>>, vector<128x128xf32>
    %cst_234 = arith.constant dense<0.000000e+00> : vector<8x128xf32>
    %245 = tpu.matmul %240, %244, %cst_234 {dimension_numbers = #tpu.dot_dimension_numbers<[1], [0], [0], [1], [0, 0, 1, 1], [], []>} : vector<8x128xf32>, vector<128x128xf32>, vector<8x128xf32> -> vector<8x128xf32>
    %246 = arith.addf %243, %245 : vector<8x128xf32>
    %247 = math.tanh %246 : vector<8x128xf32>
    %c3_i32 = arith.constant 3 : i32
    %248 = arith.index_cast %c3_i32 : i32 to index
    %c0_235 = arith.constant 0 : index
    %c0_236 = arith.constant 0 : index
    %249 = vector.load %arg6[%248, %c0_235, %c0_236] : memref<8x8x128xf32, #tpu.memory_space<vmem>>, vector<1x8x128xf32>
    %250 = vector.shape_cast %249 : vector<1x8x128xf32> to vector<8x128xf32>
    %c0_237 = arith.constant 0 : index
    %c0_238 = arith.constant 0 : index
    %251 = vector.load %arg2[%c0_237, %c0_238] : memref<128x128xf32, #tpu.memory_space<vmem>>, vector<128x128xf32>
    %cst_239 = arith.constant dense<0.000000e+00> : vector<8x128xf32>
    %252 = tpu.matmul %247, %251, %cst_239 {dimension_numbers = #tpu.dot_dimension_numbers<[1], [0], [0], [1], [0, 0, 1, 1], [], []>} : vector<8x128xf32>, vector<128x128xf32>, vector<8x128xf32> -> vector<8x128xf32>
    %253 = arith.addf %250, %252 : vector<8x128xf32>
    %254 = math.tanh %253 : vector<8x128xf32>
    %c4_i32 = arith.constant 4 : i32
    %255 = arith.index_cast %c4_i32 : i32 to index
    %c0_240 = arith.constant 0 : index
    %c0_241 = arith.constant 0 : index
    %256 = vector.load %arg6[%255, %c0_240, %c0_241] : memref<8x8x128xf32, #tpu.memory_space<vmem>>, vector<1x8x128xf32>
    %257 = vector.shape_cast %256 : vector<1x8x128xf32> to vector<8x128xf32>
    %c0_242 = arith.constant 0 : index
    %c0_243 = arith.constant 0 : index
    %258 = vector.load %arg2[%c0_242, %c0_243] : memref<128x128xf32, #tpu.memory_space<vmem>>, vector<128x128xf32>
    %cst_244 = arith.constant dense<0.000000e+00> : vector<8x128xf32>
    %259 = tpu.matmul %254, %258, %cst_244 {dimension_numbers = #tpu.dot_dimension_numbers<[1], [0], [0], [1], [0, 0, 1, 1], [], []>} : vector<8x128xf32>, vector<128x128xf32>, vector<8x128xf32> -> vector<8x128xf32>
    %260 = arith.addf %257, %259 : vector<8x128xf32>
    %261 = math.tanh %260 : vector<8x128xf32>
    %c5_i32 = arith.constant 5 : i32
    %262 = arith.index_cast %c5_i32 : i32 to index
    %c0_245 = arith.constant 0 : index
    %c0_246 = arith.constant 0 : index
    %263 = vector.load %arg6[%262, %c0_245, %c0_246] : memref<8x8x128xf32, #tpu.memory_space<vmem>>, vector<1x8x128xf32>
    %264 = vector.shape_cast %263 : vector<1x8x128xf32> to vector<8x128xf32>
    %c0_247 = arith.constant 0 : index
    %c0_248 = arith.constant 0 : index
    %265 = vector.load %arg2[%c0_247, %c0_248] : memref<128x128xf32, #tpu.memory_space<vmem>>, vector<128x128xf32>
    %cst_249 = arith.constant dense<0.000000e+00> : vector<8x128xf32>
    %266 = tpu.matmul %261, %265, %cst_249 {dimension_numbers = #tpu.dot_dimension_numbers<[1], [0], [0], [1], [0, 0, 1, 1], [], []>} : vector<8x128xf32>, vector<128x128xf32>, vector<8x128xf32> -> vector<8x128xf32>
    %267 = arith.addf %264, %266 : vector<8x128xf32>
    %268 = math.tanh %267 : vector<8x128xf32>
    %c6_i32 = arith.constant 6 : i32
    %269 = arith.index_cast %c6_i32 : i32 to index
    %c0_250 = arith.constant 0 : index
    %c0_251 = arith.constant 0 : index
    %270 = vector.load %arg6[%269, %c0_250, %c0_251] : memref<8x8x128xf32, #tpu.memory_space<vmem>>, vector<1x8x128xf32>
    %271 = vector.shape_cast %270 : vector<1x8x128xf32> to vector<8x128xf32>
    %c0_252 = arith.constant 0 : index
    %c0_253 = arith.constant 0 : index
    %272 = vector.load %arg2[%c0_252, %c0_253] : memref<128x128xf32, #tpu.memory_space<vmem>>, vector<128x128xf32>
    %cst_254 = arith.constant dense<0.000000e+00> : vector<8x128xf32>
    %273 = tpu.matmul %268, %272, %cst_254 {dimension_numbers = #tpu.dot_dimension_numbers<[1], [0], [0], [1], [0, 0, 1, 1], [], []>} : vector<8x128xf32>, vector<128x128xf32>, vector<8x128xf32> -> vector<8x128xf32>
    %274 = arith.addf %271, %273 : vector<8x128xf32>
    %275 = math.tanh %274 : vector<8x128xf32>
    %c7_i32 = arith.constant 7 : i32
    %276 = arith.index_cast %c7_i32 : i32 to index
    %c0_255 = arith.constant 0 : index
    %c0_256 = arith.constant 0 : index
    %277 = vector.load %arg6[%276, %c0_255, %c0_256] : memref<8x8x128xf32, #tpu.memory_space<vmem>>, vector<1x8x128xf32>
    %278 = vector.shape_cast %277 : vector<1x8x128xf32> to vector<8x128xf32>
    %c0_257 = arith.constant 0 : index
    %c0_258 = arith.constant 0 : index
    %279 = vector.load %arg2[%c0_257, %c0_258] : memref<128x128xf32, #tpu.memory_space<vmem>>, vector<128x128xf32>
    %cst_259 = arith.constant dense<0.000000e+00> : vector<8x128xf32>
    %280 = tpu.matmul %275, %279, %cst_259 {dimension_numbers = #tpu.dot_dimension_numbers<[1], [0], [0], [1], [0, 0, 1, 1], [], []>} : vector<8x128xf32>, vector<128x128xf32>, vector<8x128xf32> -> vector<8x128xf32>
    %281 = arith.addf %278, %280 : vector<8x128xf32>
    %282 = math.tanh %281 : vector<8x128xf32>
    %c8_i32 = arith.constant 8 : i32
    %c0_260 = arith.constant 0 : index
    %c0_261 = arith.constant 0 : index
    %283 = vector.load %arg3[%c0_260, %c0_261] : memref<128x128xf32, #tpu.memory_space<vmem>>, vector<128x128xf32>
    %cst_262 = arith.constant dense<0.000000e+00> : vector<8x128xf32>
    %284 = tpu.matmul %282, %283, %cst_262 {dimension_numbers = #tpu.dot_dimension_numbers<[1], [0], [0], [1], [0, 0, 1, 1], [], []>} : vector<8x128xf32>, vector<128x128xf32>, vector<8x128xf32> -> vector<8x128xf32>
    %c0_263 = arith.constant 0 : index
    %c0_264 = arith.constant 0 : index
    %285 = vector.load %arg4[%c0_263, %c0_264] : memref<1x128xf32, #tpu.memory_space<vmem>>, vector<1x128xf32>
    %286 = vector.broadcast %285 : vector<1x128xf32> to vector<8x128xf32>
    %287 = arith.addf %284, %286 : vector<8x128xf32>
    %288 = tpu.iota {dimensions = array<i32: 1>} : vector<8x128xi32>
    %c4_i32_265 = arith.constant 4 : i32
    %289 = vector.broadcast %c4_i32_265 : i32 to vector<8x128xi32>
    %290 = arith.cmpi slt, %288, %289 : vector<8x128xi32>
    %cst_266 = arith.constant -1.000000e+30 : f32
    %291 = vector.broadcast %cst_266 : f32 to vector<8x128xf32>
    %292 = arith.select %290, %287, %291 : vector<8x128xi1>, vector<8x128xf32>
    %cst_267 = arith.constant dense<0xFF800000> : vector<8xf32>
    %293 = vector.multi_reduction <maximumf>, %292, %cst_267 [1] : vector<8x128xf32> to vector<8xf32>
    %294 = vector.shape_cast %293 : vector<8xf32> to vector<8x1xf32>
    %295 = vector.broadcast %294 : vector<8x1xf32> to vector<8x128xf32>
    %296 = arith.subf %292, %295 : vector<8x128xf32>
    %297 = math.exp %296 : vector<8x128xf32>
    %cst_268 = arith.constant dense<0.000000e+00> : vector<8xf32>
    %298 = vector.multi_reduction <add>, %297, %cst_268 [1] : vector<8x128xf32> to vector<8xf32>
    %299 = vector.shape_cast %298 : vector<8xf32> to vector<8x1xf32>
    %300 = tpu.reciprocal %299 : vector<8x1xf32> -> vector<8x1xf32>
    %301 = vector.broadcast %300 : vector<8x1xf32> to vector<8x128xf32>
    %302 = arith.mulf %297, %301 : vector<8x128xf32>
    %c0_269 = arith.constant 0 : index
    %c0_270 = arith.constant 0 : index
    %303 = vector.load %arg5[%c0_269, %c0_270] : memref<8x128xf32, #tpu.memory_space<vmem>>, vector<8x128xf32>
    tpu.vector_store %arg5[%c0_269, %c0_270], %302 {strides = array<i32>} : memref<8x128xf32, #tpu.memory_space<vmem>>, vector<8x128xf32>,
    return
  }
}

</mosaic_0001>

<bundles_post_ra>
// kernel: tpu_custom_call.1
= control target key start
LH: loop header
LB: loop body
LE: loop exit
PB: predicated region body
PF: predicated region fallthrough
CT: control target
= control target key end

     0   :  { %10 = vsyncpa [#allocation6], 0  ;;  %s1998_s0 = inlined_call_operand.hbm [shape: s32[4,8], index: 0, kind: input, shape index: {}]   ;;  %s1999_s1 = inlined_call_operand.hbm [shape: f32[32,1,128], index: 1, kind: input, shape index: {}]   ;;  %s2000_s2 = inlined_call_operand.hbm [shape: f32[128,128], index: 2, kind: input, shape index: {}]   ;;  %s2001_s3 = inlined_call_operand.hbm [shape: f32[128,128], index: 3, kind: input, shape index: {}]   ;;  %s2002_s4 = inlined_call_operand.vmem [shape: f32[1,128], index: 4, kind: input, shape index: {}]   ;;  %s2003_s5 = inlined_call_operand.hbm [shape: f32[8,128], index: 5, kind: output, shape index: {}]  }
   0x1   :  { %11 = vsyncpa [#allocation4], 0 }
   0x2   :  { %12 = vsyncpa [#allocation9], 0 }
   0x3   :  { %13 = vsyncpa [#allocation5], 0  ;;  %s1599_s18 = smov [#allocation8]  }
   0x4   :  { %s39_s19 = sshll.u32 %s1599_s18, 4  ;;  %s40_s19 = int_to_ptr.vmem [resolvable:$true] %s39_s19 }
   0x5   :  { %s1511_s20 = scalar_lea.vmem %s40_s19, 2048  ;;  %p1516_p1 = scmp.lt.s32.totalorder %s40_s19, %s40_s19 }
   0x6   :  { %p1512_p0 = scmp.ne.s32.totalorder %s40_s19, %s1511_s20  ;;  %p1517_p2 = scmp.lt.s32.totalorder %s1511_s20, %s1511_s20 }
   0x8   :  { %p1518_p3 = por %p1517_p2, %p1516_p1 }
   0xa   :  { %p1519_p4 = pnand %p1518_p3, %p1512_p0 }
   0xc   :  { %1522 = shalt.err (!%p1519_p4)
}
   0xd   :  { %s1600_s21 = smov 128   ;;  %s1601_s22 = smov 8  }
   0xe   :  { %45 = dma.hbm_to_vmem [thread:$0]  %s2000_s2, 2048, %s40_s19, [#allocation9], %s1600_s21, %s1600_s21, %s1601_s22  }
   0xf   :  { %s1602_s25 = smov [#allocation3]   ;;  %s1603_s28 = smov [#allocation7]  }
  0x10   :  { %21 = dma.hbm_to_smem %s1998_s0, 64, %s1602_s25, [#allocation6]  }
  0x11   :  { %s27_s29 = sshll.u32 %s1603_s28, 4  ;;  %s28_s29 = int_to_ptr.vmem [resolvable:$true] %s27_s29 }
  0x12   :  { %s1539_s30 = scalar_lea.vmem %s28_s29, 512  ;;  %p1544_p6 = scmp.lt.s32.totalorder %s28_s29, %s28_s29 }
  0x13   :  { %p1540_p5 = scmp.ne.s32.totalorder %s28_s29, %s1539_s30  ;;  %p1545_p7 = scmp.lt.s32.totalorder %s1539_s30, %s1539_s30 }
  0x15   :  { %p1546_p8 = por %p1545_p7, %p1544_p6 }
  0x17   :  { %p1547_p9 = pnand %p1546_p8, %p1540_p5 }
  0x19   :  { %1550 = shalt.err (!%p1547_p9)
}
  0x1a   :  { %s1604_s6 = smov 16   ;;  %s1605_s7 = smov 1  }
  0x1b   :  { %33 = dma.hbm_to_vmem [thread:$0]  %s1999_s1, 512, %s28_s29, [#allocation4], %s1604_s6, %s1604_s6, %s1605_s7  }
  0x1c   :  { %s1606_s2 = smov [#allocation10]  }
  0x1d   :  { %s51_s10 = sshll.u32 %s1606_s2, 4  ;;  %s52_s10 = int_to_ptr.vmem [resolvable:$true] %s51_s10 }
  0x1e   :  { %s1559_s0 = scalar_lea.vmem %s52_s10, 2048  ;;  %p1564_p11 = scmp.lt.s32.totalorder %s52_s10, %s52_s10 }
  0x1f   :  { %p1560_p10 = scmp.ne.s32.totalorder %s52_s10, %s1559_s0  ;;  %p1565_p12 = scmp.lt.s32.totalorder %s1559_s0, %s1559_s0 }
  0x21   :  { %p1566_p13 = por %p1565_p12, %p1564_p11 }
  0x23   :  { %p1567_p0 = pnand %p1566_p13, %p1560_p10 }
  0x25   :  { %1570 = shalt.err (!%p1567_p0)
}
  0x26   :  { %57 = dma.hbm_to_vmem [thread:$0]  %s2001_s3, 2048, %s52_s10, [#allocation9], %s1600_s21, %s1600_s21, %s1601_s22  }
  0x27   :  { %1591 = dma.done.wait [#allocation6], 64  }
  0x28   :  { %1592 = vsyncadd [#allocation6], 4294967232 }
  0x29   :  { %1593 = dma.done.wait [#allocation4], 512  }
  0x2a   :  { %1594 = vsyncadd [#allocation4], 4294966784 }
  0x2b   :  { %1595 = dma.done.wait [#allocation9], 4096  }
  0x2c   :  { %1596 = vsyncadd [#allocation9], 4294963200 }
  0x2d   :  { %72 = sfence }
  0x2e   :  { %v1658_v0 = vld [vmem:[#allocation8 + $0x78] sm:$0xff]  ;;  %v1607_v1 = vmov 0.0   ;;  %v1669_v2 = vld [vmem:[#allocation8 + $0x70] sm:$0xff]  ;;  %vm1608_vm0 = vmmov 0   ;;  %s81_s1 = sld [smem:[#allocation3]]  ;;  %v1676_v3 = vld [vmem:[#allocation8 + $0x68] sm:$0xff] }
  0x2f   :  { %1157 = vmatprep.subr.mxu0 %v1607_v1  ;;  %73 = vst [vmem:[#allocation2] sm:$0xff] %v1607_v1  ;;  %74 = vst [vmem:[#allocation2 + $0x8] sm:$0xff] %v1607_v1  ;;  %1189 = vmatprep.mubr.msk.f32.mxu0 %vm1608_vm0, %v1607_v1  ;;  %s972_s3 = sld [smem:[#allocation3 + $0x80]]  ;;  %v1684_v4 = vld [vmem:[#allocation8 + $0x60] sm:$0xff]  ;;  %v1690_v5 = vld [vmem:[#allocation8 + $0x58] sm:$0xff] }
  0x30   :  { %75 = vst [vmem:[#allocation2 + $0x10] sm:$0xff] %v1607_v1  ;;  %76 = vst [vmem:[#allocation2 + $0x18] sm:$0xff] %v1607_v1  ;;  %1158 = vmatpush3.msra.mxu0 %v1658_v0  ;;  %1192 = vmatprep.subr.mxu1 %v1607_v1  ;;  %s973_s13 = sld [smem:[#allocation3 + $0x100]]  ;;  %v1696_v7 = vld [vmem:[#allocation8 + $0x50] sm:$0xff]  ;;  %v1702_v10 = vld [vmem:[#allocation8 + $0x48] sm:$0xff] }
  0x31   :  { %77 = vst [vmem:[#allocation2 + $0x20] sm:$0xff] %v1607_v1  ;;  %78 = vst [vmem:[#allocation2 + $0x28] sm:$0xff] %v1607_v1  ;;  %1159 = vmatprep.subr.mxu0 %v1607_v1  ;;  %1193 = vmatpush3.msra.mxu1 %v1658_v0  ;;  %s1681_s14 = sld [smem:[#allocation3 + $0x180]]  ;;  %v1709_v12 = vld [vmem:[#allocation8 + $0x40] sm:$0xff]  ;;  %v1715_v13 = vld [vmem:[#allocation8 + $0x38] sm:$0xff] }
  0x32   :  { %79 = vst [vmem:[#allocation2 + $0x30] sm:$0xff] %v1607_v1  ;;  %80 = vst [vmem:[#allocation2 + $0x38] sm:$0xff] %v1607_v1  ;;  %1160 = vmatpush3.msra.mxu0 %v1669_v2  ;;  %1194 = vmatprep.subr.mxu1 %v1607_v1  ;;  %v1721_v14 = vld [vmem:[#allocation8 + $0x30] sm:$0xff]  ;;  %v1727_v15 = vld [vmem:[#allocation8 + $0x28] sm:$0xff]  ;;  %s975_s19 = sld [smem:[#allocation3 + $0x1]] }
  0x33   :  { %1161 = vmatprep.subr.mxu0 %v1607_v1  ;;  %1195 = vmatpush3.msra.mxu1 %v1669_v2  ;;  %v1733_v16 = vld [vmem:[#allocation8 + $0x20] sm:$0xff]  ;;  %v1739_v17 = vld [vmem:[#allocation8 + $0x18] sm:$0xff]  ;;  %v1745_v18 = vld [vmem:[#allocation8 + $0x10] sm:$0xff]  ;;  %s976_s20 = sld [smem:[#allocation3 + $0x81]] }
  0x34   :  { %1162 = vmatpush3.msra.mxu0 %v1676_v3  ;;  %1196 = vmatprep.subr.mxu1 %v1607_v1  ;;  %s82_s15 = scalar_lea.vmem [#allocation7], %s81_s1  ;;  %v1751_v19 = vld [vmem:[#allocation8 + $0x8] sm:$0xff]  ;;  %v1757_v20 = vld [vmem:[#allocation8] sm:$0xff]  ;;  %s977_s21 = sld [smem:[#allocation3 + $0x101]] }
  0x35   :  { %1163 = vmatprep.subr.mxu0 %v1607_v1  ;;  %1197 = vmatpush3.msra.mxu1 %v1676_v3  ;;  %v83_v6 = vld [vmem:[%s82_s15] sm:$0x1]  ;;  %s86_s16 = scalar_lea.vmem [#allocation7], %s972_s3  ;;  %s978_s22 = sld [smem:[#allocation3 + $0x181]] }
  0x36   :  { %1164 = vmatpush3.msra.mxu0 %v1684_v4  ;;  %1198 = vmatprep.subr.mxu1 %v1607_v1  ;;  %84 = vst [vmem:[#allocation2] sm:$0x1] %v83_v6  ;;  %v87_v8 = vld [vmem:[%s86_s16] sm:$0x1]  ;;  %s90_s17 = scalar_lea.vmem [#allocation7], %s973_s13  ;;  %s979_s27 = sld [smem:[#allocation3 + $0x2]] }
  0x37   :  { %1165 = vmatprep.subr.mxu0 %v1607_v1  ;;  %1199 = vmatpush3.msra.mxu1 %v1684_v4  ;;  %88 = vst [vmem:[#allocation2 + $0x1] sm:$0x1] %v87_v8  ;;  %v91_v9 = vld [vmem:[%s90_s17] sm:$0x1]  ;;  %s94_s18 = scalar_lea.vmem [#allocation7], %s1681_s14  ;;  %s980_s28 = sld [smem:[#allocation3 + $0x82]] }
  0x38   :  { %1166 = vmatpush3.msra.mxu0 %v1690_v5  ;;  %1200 = vmatprep.subr.mxu1 %v1607_v1  ;;  %92 = vst [vmem:[#allocation2 + $0x2] sm:$0x1] %v91_v9  ;;  %v95_v11 = vld [vmem:[%s94_s18] sm:$0x1]  ;;  %s98_s23 = scalar_lea.vmem [#allocation7], %s975_s19  ;;  %s981_s29 = sld [smem:[#allocation3 + $0x102]] }
  0x39   :  { %1167 = vmatprep.subr.mxu0 %v1607_v1  ;;  %1201 = vmatpush3.msra.mxu1 %v1690_v5  ;;  %96 = vst [vmem:[#allocation2 + $0x3] sm:$0x1] %v95_v11  ;;  %v99_v21 = vld [vmem:[%s98_s23] sm:$0x1]  ;;  %s103_s24 = scalar_lea.vmem [#allocation7], %s976_s20  ;;  %s982_s30 = sld [smem:[#allocation3 + $0x182]] }
  0x3a   :  { %1168 = vmatpush3.msra.mxu0 %v1696_v7  ;;  %1202 = vmatprep.subr.mxu1 %v1607_v1  ;;  %101 = vst [vmem:[#allocation2 + $0x8] sm:$0x1] %v99_v21  ;;  %v104_v22 = vld [vmem:[%s103_s24] sm:$0x1]  ;;  %s107_s25 = scalar_lea.vmem [#allocation7], %s977_s21  ;;  %s983_s2 = sld [smem:[#allocation3 + $0x3]] }
  0x3b   :  { %1169 = vmatprep.subr.mxu0 %v1607_v1  ;;  %1203 = vmatpush3.msra.mxu1 %v1696_v7  ;;  %105 = vst [vmem:[#allocation2 + $0x9] sm:$0x1] %v104_v22  ;;  %v108_v23 = vld [vmem:[%s107_s25] sm:$0x1]  ;;  %s111_s26 = scalar_lea.vmem [#allocation7], %s978_s22  ;;  %s984_s10 = sld [smem:[#allocation3 + $0x83]] }
  0x3c   :  { %1170 = vmatpush3.msra.mxu0 %v1702_v10  ;;  %1204 = vmatprep.subr.mxu1 %v1607_v1  ;;  %109 = vst [vmem:[#allocation2 + $0xa] sm:$0x1] %v108_v23  ;;  %v112_v24 = vld [vmem:[%s111_s26] sm:$0x1]  ;;  %s115_s6 = scalar_lea.vmem [#allocation7], %s979_s27  ;;  %s985_s0 = sld [smem:[#allocation3 + $0x103]] }
  0x3d   :  { %1171 = vmatprep.subr.mxu0 %v1607_v1  ;;  %1205 = vmatpush3.msra.mxu1 %v1702_v10  ;;  %113 = vst [vmem:[#allocation2 + $0xb] sm:$0x1] %v112_v24  ;;  %v116_v30 = vld [vmem:[%s115_s6] sm:$0x1]  ;;  %s120_s7 = scalar_lea.vmem [#allocation7], %s980_s28  ;;  %s986_s11 = sld [smem:[#allocation3 + $0x183]] }
  0x3e   :  { %1172 = vmatpush3.msra.mxu0 %v1709_v12  ;;  %1206 = vmatprep.subr.mxu1 %v1607_v1  ;;  %118 = vst [vmem:[#allocation2 + $0x10] sm:$0x1] %v116_v30  ;;  %v121_v31 = vld [vmem:[%s120_s7] sm:$0x1]  ;;  %s124_s8 = scalar_lea.vmem [#allocation7], %s981_s29  ;;  %s987_s14 = sld [smem:[#allocation3 + $0x4]] }
  0x3f   :  { %1173 = vmatprep.subr.mxu0 %v1607_v1  ;;  %1207 = vmatpush3.msra.mxu1 %v1709_v12  ;;  %122 = vst [vmem:[#allocation2 + $0x11] sm:$0x1] %v121_v31  ;;  %v125_v32 = vld [vmem:[%s124_s8] sm:$0x1]  ;;  %s128_s9 = scalar_lea.vmem [#allocation7], %s982_s30  ;;  %s988_s15 = sld [smem:[#allocation3 + $0x84]] }
  0x40   :  { %1174 = vmatpush3.msra.mxu0 %v1715_v13  ;;  %1208 = vmatprep.subr.mxu1 %v1607_v1  ;;  %v216_v25 = vld [vmem:[#allocation2] sm:$0xff]  ;;  %126 = vst [vmem:[#allocation2 + $0x12] sm:$0x1] %v125_v32  ;;  %s132_s12 = scalar_lea.vmem [#allocation7], %s983_s2  ;;  %s989_s16 = sld [smem:[#allocation3 + $0x104]]  ;;  %v825_v21 = vld [vmem:[#allocation10 + $0x48] sm:$0xff] }
  0x41   :  { %1175 = vmatprep.subr.mxu0 %v1607_v1  ;;  %1209 = vmatpush3.msra.mxu1 %v1715_v13  ;;  %v129_v33 = vld [vmem:[%s128_s9] sm:$0x1]  ;;  %s137_s1 = scalar_lea.vmem [#allocation7], %s984_s10  ;;  %s990_s17 = sld [smem:[#allocation3 + $0x184]]  ;;  %v822_v30 = vld [vmem:[#allocation10 + $0x30] sm:$0xff]  ;;  %v821_v31 = vld [vmem:[#allocation10 + $0x28] sm:$0xff] }
  0x42   :  { %1176 = vmatpush3.msra.mxu0 %v1721_v14  ;;  %1210 = vmatprep.subr.mxu1 %v1607_v1  ;;  %130 = vst [vmem:[#allocation2 + $0x13] sm:$0x1] %v129_v33  ;;  %v133_v39 = vld [vmem:[%s132_s12] sm:$0x1]  ;;  %s141_s3 = scalar_lea.vmem [#allocation7], %s985_s0  ;;  %s991_s22 = sld [smem:[#allocation3 + $0x5]] }
  0x43   :  { %1177 = vmatprep.subr.mxu0 %v1607_v1  ;;  %1211 = vmatpush3.msra.mxu1 %v1721_v14  ;;  %135 = vst [vmem:[#allocation2 + $0x18] sm:$0x1] %v133_v39  ;;  %v138_v40 = vld [vmem:[%s137_s1] sm:$0x1]  ;;  %s145_s13 = scalar_lea.vmem [#allocation7], %s986_s11  ;;  %s992_s23 = sld [smem:[#allocation3 + $0x85]] }
  0x44   :  { %1178 = vmatpush3.msra.mxu0 %v1727_v15  ;;  %1212 = vmatprep.subr.mxu1 %v1607_v1  ;;  %v305_v34 = vld [vmem:[#allocation2 + $0x8] sm:$0xff]  ;;  %139 = vst [vmem:[#allocation2 + $0x19] sm:$0x1] %v138_v40  ;;  %v142_v41 = vld [vmem:[%s141_s3] sm:$0x1]  ;;  %s149_s18 = scalar_lea.vmem [#allocation7], %s987_s14 }
  0x45   :  { %1179 = vmatprep.subr.mxu0 %v1607_v1  ;;  %1213 = vmatpush3.msra.mxu1 %v1727_v15  ;;  %143 = vst [vmem:[#allocation2 + $0x1a] sm:$0x1] %v142_v41  ;;  %v146_v42 = vld [vmem:[%s145_s13] sm:$0x1]  ;;  %s154_s19 = scalar_lea.vmem [#allocation7], %s988_s15  ;;  %s993_s24 = sld [smem:[#allocation3 + $0x105]] }
  0x46   :  { %1180 = vmatpush3.msra.mxu0 %v1733_v16  ;;  %1214 = vmatprep.subr.mxu1 %v1607_v1  ;;  %147 = vst [vmem:[#allocation2 + $0x1b] sm:$0x1] %v146_v42  ;;  %v150_v48 = vld [vmem:[%s149_s18] sm:$0x1]  ;;  %s158_s20 = scalar_lea.vmem [#allocation7], %s989_s16  ;;  %s994_s25 = sld [smem:[#allocation3 + $0x185]]  ;;  %v909_v42 = vlaneseq }
  0x47   :  { %1181 = vmatprep.subr.mxu0 %v1607_v1  ;;  %1215 = vmatpush3.msra.mxu1 %v1733_v16  ;;  %152 = vst [vmem:[#allocation2 + $0x20] sm:$0x1] %v150_v48  ;;  %v155_v49 = vld [vmem:[%s154_s19] sm:$0x1]  ;;  %s162_s21 = scalar_lea.vmem [#allocation7], %s990_s17  ;;  %s995_s30 = sld [smem:[#allocation3 + $0x6]] }
  0x48   :  { %1182 = vmatpush3.msra.mxu0 %v1739_v17  ;;  %1216 = vmatprep.subr.mxu1 %v1607_v1  ;;  %156 = vst [vmem:[#allocation2 + $0x21] sm:$0x1] %v155_v49  ;;  %v159_v50 = vld [vmem:[%s158_s20] sm:$0x1]  ;;  %s166_s26 = scalar_lea.vmem [#allocation7], %s991_s22  ;;  %s996_s6 = sld [smem:[#allocation3 + $0x86]] }
  0x49   :  { %1183 = vmatprep.subr.mxu0 %v1607_v1  ;;  %1217 = vmatpush3.msra.mxu1 %v1739_v17  ;;  %v378_v43 = vld [vmem:[#allocation2 + $0x10] sm:$0xff]  ;;  %160 = vst [vmem:[#allocation2 + $0x22] sm:$0x1] %v159_v50  ;;  %v163_v51 = vld [vmem:[%s162_s21] sm:$0x1]  ;;  %s171_s27 = scalar_lea.vmem [#allocation7], %s992_s23 }
  0x4a   :  { %1184 = vmatpush3.msra.mxu0 %v1745_v18  ;;  %1218 = vmatprep.subr.mxu1 %v1607_v1  ;;  %164 = vst [vmem:[#allocation2 + $0x23] sm:$0x1] %v163_v51  ;;  %v167_v57 = vld [vmem:[%s166_s26] sm:$0x1]  ;;  %s997_s7 = sld [smem:[#allocation3 + $0x106]]  ;;  %v819_v33 = vld [vmem:[#allocation10 + $0x18] sm:$0xff] }
  0x4b   :  { %1185 = vmatprep.subr.mxu0 %v1607_v1  ;;  %1219 = vmatpush3.msra.mxu1 %v1745_v18  ;;  %169 = vst [vmem:[#allocation2 + $0x28] sm:$0x1] %v167_v57  ;;  %v172_v58 = vld [vmem:[%s171_s27] sm:$0x1]  ;;  %s175_s28 = scalar_lea.vmem [#allocation7], %s993_s24  ;;  %s998_s8 = sld [smem:[#allocation3 + $0x186]] }
  0x4c   :  { %1186 = vmatpush3.msra.mxu0 %v1751_v19  ;;  %1220 = vmatprep.subr.mxu1 %v1607_v1  ;;  %173 = vst [vmem:[#allocation2 + $0x29] sm:$0x1] %v172_v58  ;;  %v176_v59 = vld [vmem:[%s175_s28] sm:$0x1]  ;;  %s179_s29 = scalar_lea.vmem [#allocation7], %s994_s25  ;;  %s999_s11 = sld [smem:[#allocation3 + $0x7]] }
  0x4d   :  { %1187 = vmatprep.subr.mxu0 %v1607_v1  ;;  %1221 = vmatpush3.msra.mxu1 %v1751_v19  ;;  %v451_v52 = vld [vmem:[#allocation2 + $0x18] sm:$0xff]  ;;  %177 = vst [vmem:[#allocation2 + $0x2a] sm:$0x1] %v176_v59  ;;  %v180_v60 = vld [vmem:[%s179_s29] sm:$0x1]  ;;  %s183_s9 = scalar_lea.vmem [#allocation7], %s995_s30 }
  0x4e   :  { %1188 = vmatpush3.msra.mxu0 %v1757_v20  ;;  %1222 = vmatprep.subr.mxu1 %v1607_v1  ;;  %181 = vst [vmem:[#allocation2 + $0x2b] sm:$0x1] %v180_v60  ;;  %s188_s2 = scalar_lea.vmem [#allocation7], %s996_s6  ;;  %s1000_s12 = sld [smem:[#allocation3 + $0x87]]  ;;  %v820_v32 = vld [vmem:[#allocation10 + $0x20] sm:$0xff] }
  0x4f   :  { %1190 = vmatmul.mubr.f32.vlgmr.msra.gmra.mxu0 %v1607_v1  ;;  %1223 = vmatpush3.msra.mxu1 %v1757_v20  ;;  %s1001_s1 = sld [smem:[#allocation3 + $0x107]]  ;;  %s1609_s19 = smov [#allocation11]  }
  0x50   :  { %1224 = vmatprep.mubr.msk.f32.mxu1 %vm1608_vm0, %v1607_v1  ;;  %1227 = vmatprep.subr.mxu0 %v1607_v1  ;;  %s192_s10 = scalar_lea.vmem [#allocation7], %s997_s7  ;;  %s1002_s3 = sld [smem:[#allocation3 + $0x187]] }
  0x51   :  { %1228 = vmatpush3.msra.mxu0 %v1658_v0  ;;  %1259 = vmatprep.mubr.msk.f32.mxu0 %vm1608_vm0, %v1607_v1  ;;  %v524_v61 = vld [vmem:[#allocation2 + $0x20] sm:$0xff]  ;;  %s196_s0 = scalar_lea.vmem [#allocation7], %s998_s8  ;;  %s929_s20 = sshll.u32 %s1609_s19, 4  ;;  %s930_s20 = int_to_ptr.vmem [resolvable:$true] %s929_s20 }
  0x52   :  { %1229 = vmatprep.subr.mxu0 %v1607_v1  ;;  %1262 = vmatprep.subr.mxu1 %v1607_v1  ;;  %s200_s13 = scalar_lea.vmem [#allocation7], %s999_s11  ;;  %p1576_p2 = scmp.lt.s32.totalorder %s930_s20, %s930_s20 }
  0x53   :  { %1230 = vmatpush3.msra.mxu0 %v1669_v2 }
  0x54   :  { %1231 = vmatprep.subr.mxu0 %v1607_v1  ;;  %s205_s14 = scalar_lea.vmem [#allocation7], %s1000_s12 }
  0x55   :  { %1232 = vmatpush3.msra.mxu0 %v1676_v3  ;;  %s209_s15 = scalar_lea.vmem [#allocation7], %s1001_s1 }
  0x56   :  { %1233 = vmatprep.subr.mxu0 %v1607_v1  ;;  %s213_s16 = scalar_lea.vmem [#allocation7], %s1002_s3 }
  0x57   :  { %1234 = vmatpush3.msra.mxu0 %v1684_v4  ;;  %v214_v22 = vld [vmem:[%s213_s16] sm:$0x1] }
  0x58   :  { %1235 = vmatprep.subr.mxu0 %v1607_v1  ;;  %215 = vst [vmem:[#allocation2 + $0x3b] sm:$0x1] %v214_v22 }
  0x59   :  { %1236 = vmatpush3.msra.mxu0 %v1690_v5 }
  0x5a   :  { %1237 = vmatprep.subr.mxu0 %v1607_v1 }
  0x5b   :  { %1238 = vmatpush3.msra.mxu0 %v1696_v7 }
  0x5c   :  { %1239 = vmatprep.subr.mxu0 %v1607_v1 }
  0x5d   :  { %1240 = vmatpush3.msra.mxu0 %v1702_v10 }
  0x5e   :  { %1241 = vmatprep.subr.mxu0 %v1607_v1 }
  0x5f   :  { %1242 = vmatpush3.msra.mxu0 %v1709_v12 }
  0x60   :  { %1243 = vmatprep.subr.mxu0 %v1607_v1 }
  0x61   :  { %1244 = vmatpush3.msra.mxu0 %v1715_v13 }
  0x62   :  { %1245 = vmatprep.subr.mxu0 %v1607_v1 }
  0x63   :  { %1246 = vmatpush3.msra.mxu0 %v1721_v14 }
  0x64   :  { %1247 = vmatprep.subr.mxu0 %v1607_v1 }
  0x65   :  { %1248 = vmatpush3.msra.mxu0 %v1727_v15 }
  0x66   :  { %1249 = vmatprep.subr.mxu0 %v1607_v1 }
  0x67   :  { %1250 = vmatpush3.msra.mxu0 %v1733_v16 }
  0x68   :  { %1251 = vmatprep.subr.mxu0 %v1607_v1 }
  0x69   :  { %1252 = vmatpush3.msra.mxu0 %v1739_v17 }
  0x6a   :  { %1253 = vmatprep.subr.mxu0 %v1607_v1 }
  0x6b   :  { %1254 = vmatpush3.msra.mxu0 %v1745_v18 }
  0x6c   :  { %1255 = vmatprep.subr.mxu0 %v1607_v1 }
  0x6d   :  { %1256 = vmatpush3.msra.mxu0 %v1751_v19 }
  0x6e   :  { %1257 = vmatprep.subr.mxu0 %v1607_v1 }
  0x6f   :  { %1258 = vmatpush3.msra.mxu0 %v1757_v20 }
  0x70   :  { %1297 = vmatprep.subr.mxu0 %v1607_v1 }
 0x10f   :  { %v299_v26 = vpop.f32.mrf.mxu0 }
 0x110   :  { %v303_v27 = vadd.f32 %v299_v26, %v216_v25 }
 0x111   :  { %v1191_v28 = vpop.f32.mrf.mxu0 }
 0x112   :  { %1483 = vtanh.f32 %v303_v27  ;;  %v824_v28 = vld [vmem:[#allocation10 + $0x40] sm:$0xff] }
 0x11f   :  { %v1484_v29 = vpop.eup %1483 }
 0x120   :  { %1225 = vmatmul.mubr.f32.vlgmr.msra.gmra.mxu1 %v1484_v29  ;;  %v823_v29 = vld [vmem:[#allocation10 + $0x38] sm:$0xff] }
 0x121   :  { %1263 = vmatpush3.msra.mxu1 %v1658_v0  ;;  %1294 = vmatprep.mubr.msk.f32.mxu1 %vm1608_vm0, %v1607_v1 }
 0x122   :  { %1264 = vmatprep.subr.mxu1 %v1607_v1 }
 0x123   :  { %1265 = vmatpush3.msra.mxu1 %v1669_v2 }
 0x124   :  { %1266 = vmatprep.subr.mxu1 %v1607_v1 }
 0x125   :  { %1267 = vmatpush3.msra.mxu1 %v1676_v3 }
 0x126   :  { %1268 = vmatprep.subr.mxu1 %v1607_v1 }
 0x127   :  { %1269 = vmatpush3.msra.mxu1 %v1684_v4 }
 0x128   :  { %1270 = vmatprep.subr.mxu1 %v1607_v1 }
 0x129   :  { %1271 = vmatpush3.msra.mxu1 %v1690_v5 }
 0x12a   :  { %1272 = vmatprep.subr.mxu1 %v1607_v1 }
 0x12b   :  { %1273 = vmatpush3.msra.mxu1 %v1696_v7 }
 0x12c   :  { %1274 = vmatprep.subr.mxu1 %v1607_v1 }
 0x12d   :  { %1275 = vmatpush3.msra.mxu1 %v1702_v10 }
 0x12e   :  { %1276 = vmatprep.subr.mxu1 %v1607_v1 }
 0x12f   :  { %1277 = vmatpush3.msra.mxu1 %v1709_v12 }
 0x130   :  { %1278 = vmatprep.subr.mxu1 %v1607_v1 }
 0x131   :  { %1279 = vmatpush3.msra.mxu1 %v1715_v13 }
 0x132   :  { %1280 = vmatprep.subr.mxu1 %v1607_v1 }
 0x133   :  { %1281 = vmatpush3.msra.mxu1 %v1721_v14 }
 0x134   :  { %1282 = vmatprep.subr.mxu1 %v1607_v1 }
 0x135   :  { %1283 = vmatpush3.msra.mxu1 %v1727_v15 }
 0x136   :  { %1284 = vmatprep.subr.mxu1 %v1607_v1 }
 0x137   :  { %1285 = vmatpush3.msra.mxu1 %v1733_v16 }
 0x138   :  { %1286 = vmatprep.subr.mxu1 %v1607_v1 }
 0x139   :  { %1287 = vmatpush3.msra.mxu1 %v1739_v17 }
 0x13a   :  { %1288 = vmatprep.subr.mxu1 %v1607_v1 }
 0x13b   :  { %1289 = vmatpush3.msra.mxu1 %v1745_v18 }
 0x13c   :  { %1290 = vmatprep.subr.mxu1 %v1607_v1 }
 0x13d   :  { %1291 = vmatpush3.msra.mxu1 %v1751_v19 }
 0x13e   :  { %1292 = vmatprep.subr.mxu1 %v1607_v1 }
 0x13f   :  { %1293 = vmatpush3.msra.mxu1 %v1757_v20 }
 0x140   :  { %1332 = vmatprep.subr.mxu1 %v1607_v1 }
 0x1e0   :  { %v372_v35 = vpop.f32.mrf.mxu1 }
 0x1e1   :  { %v376_v36 = vadd.f32 %v372_v35, %v305_v34  ;;  %v818_v34 = vld [vmem:[#allocation10 + $0x10] sm:$0xff]  ;;  %v817_v35 = vld [vmem:[#allocation10 + $0x8] sm:$0xff] }
 0x1e2   :  { %v1226_v37 = vpop.f32.mrf.mxu1 }
 0x1e3   :  { %1485 = vtanh.f32 %v376_v36  ;;  %v816_v36 = vld [vmem:[#allocation10] sm:$0xff] }
 0x1f0   :  { %v1486_v38 = vpop.eup %1485 }
 0x1f1   :  { %1260 = vmatmul.mubr.f32.vlgmr.msra.gmra.mxu0 %v1486_v38 }
 0x1f2   :  { %1298 = vmatpush3.msra.mxu0 %v1658_v0  ;;  %1329 = vmatprep.mubr.msk.f32.mxu0 %vm1608_vm0, %v1607_v1 }
 0x1f3   :  { %1299 = vmatprep.subr.mxu0 %v1607_v1 }
 0x1f4   :  { %1300 = vmatpush3.msra.mxu0 %v1669_v2 }
 0x1f5   :  { %1301 = vmatprep.subr.mxu0 %v1607_v1 }
 0x1f6   :  { %1302 = vmatpush3.msra.mxu0 %v1676_v3 }
 0x1f7   :  { %1303 = vmatprep.subr.mxu0 %v1607_v1 }
 0x1f8   :  { %1304 = vmatpush3.msra.mxu0 %v1684_v4 }
 0x1f9   :  { %1305 = vmatprep.subr.mxu0 %v1607_v1 }
 0x1fa   :  { %1306 = vmatpush3.msra.mxu0 %v1690_v5 }
 0x1fb   :  { %1307 = vmatprep.subr.mxu0 %v1607_v1 }
 0x1fc   :  { %1308 = vmatpush3.msra.mxu0 %v1696_v7 }
 0x1fd   :  { %1309 = vmatprep.subr.mxu0 %v1607_v1 }
 0x1fe   :  { %1310 = vmatpush3.msra.mxu0 %v1702_v10 }
 0x1ff   :  { %1311 = vmatprep.subr.mxu0 %v1607_v1 }
 0x200   :  { %1312 = vmatpush3.msra.mxu0 %v1709_v12 }
 0x201   :  { %1313 = vmatprep.subr.mxu0 %v1607_v1 }
 0x202   :  { %1314 = vmatpush3.msra.mxu0 %v1715_v13 }
 0x203   :  { %1315 = vmatprep.subr.mxu0 %v1607_v1 }
 0x204   :  { %1316 = vmatpush3.msra.mxu0 %v1721_v14 }
 0x205   :  { %1317 = vmatprep.subr.mxu0 %v1607_v1 }
 0x206   :  { %1318 = vmatpush3.msra.mxu0 %v1727_v15 }
 0x207   :  { %1319 = vmatprep.subr.mxu0 %v1607_v1 }
 0x208   :  { %1320 = vmatpush3.msra.mxu0 %v1733_v16 }
 0x209   :  { %1321 = vmatprep.subr.mxu0 %v1607_v1 }
 0x20a   :  { %1322 = vmatpush3.msra.mxu0 %v1739_v17 }
 0x20b   :  { %1323 = vmatprep.subr.mxu0 %v1607_v1 }
 0x20c   :  { %1324 = vmatpush3.msra.mxu0 %v1745_v18 }
 0x20d   :  { %1325 = vmatprep.subr.mxu0 %v1607_v1 }
 0x20e   :  { %1326 = vmatpush3.msra.mxu0 %v1751_v19 }
 0x20f   :  { %1327 = vmatprep.subr.mxu0 %v1607_v1 }
 0x210   :  { %1328 = vmatpush3.msra.mxu0 %v1757_v20 }
 0x211   :  { %1367 = vmatprep.subr.mxu0 %v1607_v1 }
 0x2b1   :  { %v445_v44 = vpop.f32.mrf.mxu0 }
 0x2b2   :  { %v449_v45 = vadd.f32 %v445_v44, %v378_v43  ;;  %v910_v43 = vand.u32 127, %v909_v42  ;;  %v1003_v44 = vld [vmem:[%s2002_s4] ss:$0 sm:$0xff]  ;;  %s1571_s4 = scalar_lea.vmem %s930_s20, 128 }
 0x2b3   :  { %v1261_v46 = vpop.f32.mrf.mxu0  ;;  %p1572_p1 = scmp.ne.s32.totalorder %s930_s20, %s1571_s4  ;;  %p1577_p3 = scmp.lt.s32.totalorder %s1571_s4, %s1571_s4 }
 0x2b4   :  { %1487 = vtanh.f32 %v449_v45  ;;  %vm911_vm1 = vcmp.lt.s32.totalorder %v910_v43, 4 }
 0x2b5   :  { %p1578_p4 = por %p1577_p3, %p1576_p2 }
 0x2b7   :  { %p1579_p5 = pnand %p1578_p4, %p1572_p1 }
 0x2c1   :  { %v1488_v47 = vpop.eup %1487 }
 0x2c2   :  { %1295 = vmatmul.mubr.f32.vlgmr.msra.gmra.mxu1 %v1488_v47 }
 0x2c3   :  { %1333 = vmatpush3.msra.mxu1 %v1658_v0  ;;  %1364 = vmatprep.mubr.msk.f32.mxu1 %vm1608_vm0, %v1607_v1 }
 0x2c4   :  { %1334 = vmatprep.subr.mxu1 %v1607_v1 }
 0x2c5   :  { %1335 = vmatpush3.msra.mxu1 %v1669_v2 }
 0x2c6   :  { %1336 = vmatprep.subr.mxu1 %v1607_v1 }
 0x2c7   :  { %1337 = vmatpush3.msra.mxu1 %v1676_v3 }
 0x2c8   :  { %1338 = vmatprep.subr.mxu1 %v1607_v1 }
 0x2c9   :  { %1339 = vmatpush3.msra.mxu1 %v1684_v4 }
 0x2ca   :  { %1340 = vmatprep.subr.mxu1 %v1607_v1 }
 0x2cb   :  { %1341 = vmatpush3.msra.mxu1 %v1690_v5 }
 0x2cc   :  { %1342 = vmatprep.subr.mxu1 %v1607_v1 }
 0x2cd   :  { %1343 = vmatpush3.msra.mxu1 %v1696_v7 }
 0x2ce   :  { %1344 = vmatprep.subr.mxu1 %v1607_v1 }
 0x2cf   :  { %1345 = vmatpush3.msra.mxu1 %v1702_v10 }
 0x2d0   :  { %1346 = vmatprep.subr.mxu1 %v1607_v1 }
 0x2d1   :  { %1347 = vmatpush3.msra.mxu1 %v1709_v12 }
 0x2d2   :  { %1348 = vmatprep.subr.mxu1 %v1607_v1 }
 0x2d3   :  { %1349 = vmatpush3.msra.mxu1 %v1715_v13 }
 0x2d4   :  { %1350 = vmatprep.subr.mxu1 %v1607_v1 }
 0x2d5   :  { %1351 = vmatpush3.msra.mxu1 %v1721_v14 }
 0x2d6   :  { %1352 = vmatprep.subr.mxu1 %v1607_v1 }
 0x2d7   :  { %1353 = vmatpush3.msra.mxu1 %v1727_v15 }
 0x2d8   :  { %1354 = vmatprep.subr.mxu1 %v1607_v1 }
 0x2d9   :  { %1355 = vmatpush3.msra.mxu1 %v1733_v16 }
 0x2da   :  { %1356 = vmatprep.subr.mxu1 %v1607_v1 }
 0x2db   :  { %1357 = vmatpush3.msra.mxu1 %v1739_v17 }
 0x2dc   :  { %1358 = vmatprep.subr.mxu1 %v1607_v1 }
 0x2dd   :  { %1359 = vmatpush3.msra.mxu1 %v1745_v18 }
 0x2de   :  { %1360 = vmatprep.subr.mxu1 %v1607_v1 }
 0x2df   :  { %1361 = vmatpush3.msra.mxu1 %v1751_v19 }
 0x2e0   :  { %1362 = vmatprep.subr.mxu1 %v1607_v1 }
 0x2e1   :  { %1363 = vmatpush3.msra.mxu1 %v1757_v20 }
 0x2e2   :  { %1402 = vmatprep.subr.mxu1 %v1607_v1 }
 0x382   :  { %v518_v53 = vpop.f32.mrf.mxu1 }
 0x383   :  { %v522_v54 = vadd.f32 %v518_v53, %v451_v52 }
 0x384   :  { %v1296_v55 = vpop.f32.mrf.mxu1 }
 0x385   :  { %1489 = vtanh.f32 %v522_v54 }
 0x392   :  { %v1490_v56 = vpop.eup %1489 }
 0x393   :  { %1330 = vmatmul.mubr.f32.vlgmr.msra.gmra.mxu0 %v1490_v56 }
 0x394   :  { %1368 = vmatpush3.msra.mxu0 %v1658_v0  ;;  %1399 = vmatprep.mubr.msk.f32.mxu0 %vm1608_vm0, %v1607_v1 }
 0x395   :  { %1369 = vmatprep.subr.mxu0 %v1607_v1 }
 0x396   :  { %1370 = vmatpush3.msra.mxu0 %v1669_v2 }
 0x397   :  { %1371 = vmatprep.subr.mxu0 %v1607_v1 }
 0x398   :  { %1372 = vmatpush3.msra.mxu0 %v1676_v3 }
 0x399   :  { %1373 = vmatprep.subr.mxu0 %v1607_v1 }
 0x39a   :  { %1374 = vmatpush3.msra.mxu0 %v1684_v4 }
 0x39b   :  { %1375 = vmatprep.subr.mxu0 %v1607_v1 }
 0x39c   :  { %1376 = vmatpush3.msra.mxu0 %v1690_v5 }
 0x39d   :  { %1377 = vmatprep.subr.mxu0 %v1607_v1 }
 0x39e   :  { %1378 = vmatpush3.msra.mxu0 %v1696_v7 }
 0x39f   :  { %1379 = vmatprep.subr.mxu0 %v1607_v1 }
 0x3a0   :  { %1380 = vmatpush3.msra.mxu0 %v1702_v10 }
 0x3a1   :  { %1381 = vmatprep.subr.mxu0 %v1607_v1 }
 0x3a2   :  { %1382 = vmatpush3.msra.mxu0 %v1709_v12 }
 0x3a3   :  { %1383 = vmatprep.subr.mxu0 %v1607_v1 }
 0x3a4   :  { %1384 = vmatpush3.msra.mxu0 %v1715_v13 }
 0x3a5   :  { %1385 = vmatprep.subr.mxu0 %v1607_v1 }
 0x3a6   :  { %1386 = vmatpush3.msra.mxu0 %v1721_v14 }
 0x3a7   :  { %1387 = vmatprep.subr.mxu0 %v1607_v1 }
 0x3a8   :  { %1388 = vmatpush3.msra.mxu0 %v1727_v15 }
 0x3a9   :  { %1389 = vmatprep.subr.mxu0 %v1607_v1 }
 0x3aa   :  { %1390 = vmatpush3.msra.mxu0 %v1733_v16 }
 0x3ab   :  { %1391 = vmatprep.subr.mxu0 %v1607_v1 }
 0x3ac   :  { %1392 = vmatpush3.msra.mxu0 %v1739_v17 }
 0x3ad   :  { %1393 = vmatprep.subr.mxu0 %v1607_v1 }
 0x3ae   :  { %1394 = vmatpush3.msra.mxu0 %v1745_v18 }
 0x3af   :  { %1395 = vmatprep.subr.mxu0 %v1607_v1 }
 0x3b0   :  { %1396 = vmatpush3.msra.mxu0 %v1751_v19 }
 0x3b1   :  { %1397 = vmatprep.subr.mxu0 %v1607_v1 }
 0x3b2   :  { %1398 = vmatpush3.msra.mxu0 %v1757_v20 }
 0x3b3   :  { %1437 = vmatprep.subr.mxu0 %v1607_v1 }
 0x453   :  { %v591_v62 = vpop.f32.mrf.mxu0 }
 0x454   :  { %v595_v63 = vadd.f32 %v591_v62, %v524_v61 }
 0x455   :  { %v1331_v6 = vpop.f32.mrf.mxu0 }
 0x456   :  { %1491 = vtanh.f32 %v595_v63 }
 0x463   :  { %v1492_v8 = vpop.eup %1491 }
 0x464   :  { %1365 = vmatmul.mubr.f32.vlgmr.msra.gmra.mxu1 %v1492_v8 }
 0x465   :  { %1403 = vmatpush3.msra.mxu1 %v1658_v0  ;;  %1434 = vmatprep.mubr.msk.f32.mxu1 %vm1608_vm0, %v1607_v1  ;;  %v184_v0 = vld [vmem:[%s183_s9] sm:$0x1] }
 0x466   :  { %1404 = vmatprep.subr.mxu1 %v1607_v1  ;;  %186 = vst [vmem:[#allocation2 + $0x30] sm:$0x1] %v184_v0 }
 0x467   :  { %1405 = vmatpush3.msra.mxu1 %v1669_v2  ;;  %v189_v2 = vld [vmem:[%s188_s2] sm:$0x1] }
 0x468   :  { %1406 = vmatprep.subr.mxu1 %v1607_v1  ;;  %190 = vst [vmem:[#allocation2 + $0x31] sm:$0x1] %v189_v2 }
 0x469   :  { %1407 = vmatpush3.msra.mxu1 %v1676_v3  ;;  %v193_v3 = vld [vmem:[%s192_s10] sm:$0x1] }
 0x46a   :  { %1408 = vmatprep.subr.mxu1 %v1607_v1  ;;  %194 = vst [vmem:[#allocation2 + $0x32] sm:$0x1] %v193_v3 }
 0x46b   :  { %1409 = vmatpush3.msra.mxu1 %v1684_v4  ;;  %v197_v4 = vld [vmem:[%s196_s0] sm:$0x1] }
 0x46c   :  { %1410 = vmatprep.subr.mxu1 %v1607_v1  ;;  %198 = vst [vmem:[#allocation2 + $0x33] sm:$0x1] %v197_v4 }
 0x46d   :  { %1411 = vmatpush3.msra.mxu1 %v1690_v5  ;;  %v597_v5 = vld [vmem:[#allocation2 + $0x28] sm:$0xff] }
 0x46e   :  { %1412 = vmatprep.subr.mxu1 %v1607_v1 }
 0x46f   :  { %1413 = vmatpush3.msra.mxu1 %v1696_v7 }
 0x470   :  { %1414 = vmatprep.subr.mxu1 %v1607_v1 }
 0x471   :  { %1415 = vmatpush3.msra.mxu1 %v1702_v10 }
 0x472   :  { %1416 = vmatprep.subr.mxu1 %v1607_v1 }
 0x473   :  { %1417 = vmatpush3.msra.mxu1 %v1709_v12  ;;  %v831_v12 = vld [vmem:[#allocation10 + $0x78] sm:$0xff]  ;;  %v670_v23 = vld [vmem:[#allocation2 + $0x30] sm:$0xff] }
 0x474   :  { %1418 = vmatprep.subr.mxu1 %v1607_v1 }
 0x475   :  { %1419 = vmatpush3.msra.mxu1 %v1715_v13  ;;  %v830_v13 = vld [vmem:[#allocation10 + $0x70] sm:$0xff] }
 0x476   :  { %1420 = vmatprep.subr.mxu1 %v1607_v1 }
 0x477   :  { %1421 = vmatpush3.msra.mxu1 %v1721_v14  ;;  %v829_v14 = vld [vmem:[#allocation10 + $0x68] sm:$0xff] }
 0x478   :  { %1422 = vmatprep.subr.mxu1 %v1607_v1 }
 0x479   :  { %1423 = vmatpush3.msra.mxu1 %v1727_v15  ;;  %v828_v15 = vld [vmem:[#allocation10 + $0x60] sm:$0xff] }
 0x47a   :  { %1424 = vmatprep.subr.mxu1 %v1607_v1 }
 0x47b   :  { %1425 = vmatpush3.msra.mxu1 %v1733_v16  ;;  %v827_v16 = vld [vmem:[#allocation10 + $0x58] sm:$0xff] }
 0x47c   :  { %1426 = vmatprep.subr.mxu1 %v1607_v1 }
 0x47d   :  { %1427 = vmatpush3.msra.mxu1 %v1739_v17  ;;  %v201_v17 = vld [vmem:[%s200_s13] sm:$0x1] }
 0x47e   :  { %1428 = vmatprep.subr.mxu1 %v1607_v1  ;;  %203 = vst [vmem:[#allocation2 + $0x38] sm:$0x1] %v201_v17 }
 0x47f   :  { %1429 = vmatpush3.msra.mxu1 %v1745_v18  ;;  %v826_v18 = vld [vmem:[#allocation10 + $0x50] sm:$0xff] }
 0x480   :  { %1430 = vmatprep.subr.mxu1 %v1607_v1 }
 0x481   :  { %1431 = vmatpush3.msra.mxu1 %v1751_v19  ;;  %v206_v19 = vld [vmem:[%s205_s14] sm:$0x1] }
 0x482   :  { %1432 = vmatprep.subr.mxu1 %v1607_v1  ;;  %207 = vst [vmem:[#allocation2 + $0x39] sm:$0x1] %v206_v19 }
 0x483   :  { %1433 = vmatpush3.msra.mxu1 %v1757_v20  ;;  %v210_v20 = vld [vmem:[%s209_s15] sm:$0x1] }
 0x484   :  { %211 = vst [vmem:[#allocation2 + $0x3a] sm:$0x1] %v210_v20 }
 0x48b   :  { %v743_v37 = vld [vmem:[#allocation2 + $0x38] sm:$0xff] }
 0x524   :  { %v664_v7 = vpop.f32.mrf.mxu1 }
 0x525   :  { %v668_v9 = vadd.f32 %v664_v7, %v597_v5 }
 0x526   :  { %v1366_v10 = vpop.f32.mrf.mxu1 }
 0x527   :  { %1493 = vtanh.f32 %v668_v9 }
 0x534   :  { %v1494_v11 = vpop.eup %1493 }
 0x535   :  { %1400 = vmatmul.mubr.f32.vlgmr.msra.gmra.mxu0 %v1494_v11 }
 0x536   :  { %1469 = vmatprep.mubr.msk.f32.mxu0 %vm1608_vm0, %v1607_v1  ;;  %1438 = vmatpush3.msra.mxu0 %v831_v12 }
 0x537   :  { %1439 = vmatprep.subr.mxu0 %v1607_v1 }
 0x538   :  { %1440 = vmatpush3.msra.mxu0 %v830_v13 }
 0x539   :  { %1441 = vmatprep.subr.mxu0 %v1607_v1 }
 0x53a   :  { %1442 = vmatpush3.msra.mxu0 %v829_v14 }
 0x53b   :  { %1443 = vmatprep.subr.mxu0 %v1607_v1 }
 0x53c   :  { %1444 = vmatpush3.msra.mxu0 %v828_v15 }
 0x53d   :  { %1445 = vmatprep.subr.mxu0 %v1607_v1 }
 0x53e   :  { %1446 = vmatpush3.msra.mxu0 %v827_v16 }
 0x53f   :  { %1447 = vmatprep.subr.mxu0 %v1607_v1 }
 0x540   :  { %1448 = vmatpush3.msra.mxu0 %v826_v18 }
 0x541   :  { %1449 = vmatprep.subr.mxu0 %v1607_v1 }
 0x542   :  { %1450 = vmatpush3.msra.mxu0 %v825_v21 }
 0x543   :  { %1451 = vmatprep.subr.mxu0 %v1607_v1 }
 0x544   :  { %1452 = vmatpush3.msra.mxu0 %v824_v28 }
 0x545   :  { %1453 = vmatprep.subr.mxu0 %v1607_v1 }
 0x546   :  { %1454 = vmatpush3.msra.mxu0 %v823_v29 }
 0x547   :  { %1455 = vmatprep.subr.mxu0 %v1607_v1 }
 0x548   :  { %1456 = vmatpush3.msra.mxu0 %v822_v30 }
 0x549   :  { %1457 = vmatprep.subr.mxu0 %v1607_v1 }
 0x54a   :  { %1458 = vmatpush3.msra.mxu0 %v821_v31 }
 0x54b   :  { %1459 = vmatprep.subr.mxu0 %v1607_v1 }
 0x54c   :  { %1460 = vmatpush3.msra.mxu0 %v820_v32 }
 0x54d   :  { %1461 = vmatprep.subr.mxu0 %v1607_v1 }
 0x54e   :  { %1462 = vmatpush3.msra.mxu0 %v819_v33 }
 0x54f   :  { %1463 = vmatprep.subr.mxu0 %v1607_v1 }
 0x550   :  { %1464 = vmatpush3.msra.mxu0 %v818_v34 }
 0x551   :  { %1465 = vmatprep.subr.mxu0 %v1607_v1 }
 0x552   :  { %1466 = vmatpush3.msra.mxu0 %v817_v35 }
 0x553   :  { %1467 = vmatprep.subr.mxu0 %v1607_v1 }
 0x554   :  { %1468 = vmatpush3.msra.mxu0 %v816_v36 }
 0x5f5   :  { %v737_v24 = vpop.f32.mrf.mxu0 }
 0x5f6   :  { %v741_v25 = vadd.f32 %v737_v24, %v670_v23 }
 0x5f7   :  { %v1401_v26 = vpop.f32.mrf.mxu0 }
 0x5f8   :  { %1495 = vtanh.f32 %v741_v25 }
 0x605   :  { %v1496_v27 = vpop.eup %1495 }
 0x606   :  { %1435 = vmatmul.mubr.f32.vlgmr.msra.gmra.mxu1 %v1496_v27 }
 0x6c6   :  { %v810_v38 = vpop.f32.mrf.mxu1 }
 0x6c7   :  { %v814_v39 = vadd.f32 %v810_v38, %v743_v37 }
 0x6c8   :  { %v1436_v40 = vpop.f32.mrf.mxu1 }
 0x6c9   :  { %1497 = vtanh.f32 %v814_v39 }
 0x6d6   :  { %v1498_v41 = vpop.eup %1497 }
 0x6d7   :  { %1470 = vmatmul.mubr.f32.vlgmr.msra.gmra.mxu0 %v1498_v41 }
 0x797   :  { %v905_v45 = vpop.f32.mrf.mxu0 }
 0x798   :  { %v906_v46 = vadd.f32 %v1003_v44, %v905_v45 }
 0x799   :  { %v1471_v47 = vpop.f32.mrf.mxu0 }
 0x79a   :  { %v912_v48 = vsel %vm911_vm1, %v906_v46, -1e+30 }
 0x79b   :  { %913 = vmax.xlane.f32.xlu0 %v912_v48 }
 0x824   :  { %v914_v1 = vpop.xlane.xlu0 %913 }
 0x825   :  { %v915_v49 = vsub.f32 %v912_v48, %v914_v1 }
 0x827   :  { %v916_v50 = vmul.f32 1.442695, %v915_v49 }
 0x829   :  { %1499 = vpow2.f32 %v916_v50 }
 0x836   :  { %v1500_v51 = vpop.eup %1499 }
 0x837   :  { %918 = vadd.xlane.f32.xlu0 %v1500_v51 }
 0x8c0   :  { %v919_v52 = vpop.xlane.xlu0 %918 }
 0x8c1   :  { %1501 = vrcp.f32 %v919_v52 }
 0x8ce   :  { %v1502_v53 = vpop.eup %1501 }
 0x8cf   :  { %v921_v54 = vmul.f32 %v1502_v53, %v1500_v51 }
 0x8d1   :  { %922 = vst [vmem:[#allocation11] sm:$0xff] %v921_v54 }
 0x8d2   :  { %1582 = shalt.err (!%p1579_p5)
}
 0x8d3   :  { %932 = dma.vmem_to_hbm [thread:$0]  %s930_s20, 128, %s2003_s5, [#allocation5]  }
 0x8d4   :  { %1597 = dma.done.wait [#allocation5], 128  }
 0x8d5   :  { %1598 = vsyncadd [#allocation5], 4294967168 }
 0x8d6   :  { %936 = vsyncpa [#allocation4], 1 }
 0x8d7   :  { %937 = vsyncpa [#allocation9], 1 }
 0x8d8   :  { %938 = vsyncpa [#allocation5], 1 }
 0x8d9   :  { %939 = vsyncpa [#allocation6], 1 }

</bundles_post_ra>
